<compile_context>
chip_gen: v5e
topology: v5e:2x2
jax: 0.10.0
libtpu: 0.0.40
codegen_flags: <defaults>
</compile_context>

<pallas_src>
import math
import numpy as np

import jax
import jax.numpy as jnp
from jax.experimental import pallas as pl
from jax.experimental.pallas import tpu as pltpu

EOS_TOKEN_ID = 2


# ----------------------------------------------------------------------------
# In-kernel math helpers (f32 elementwise; traced inside the Pallas kernels)
# ----------------------------------------------------------------------------
def _gelu(x):
    # tanh-approximate GELU
    return 0.5 * x * (1.0 + jnp.tanh(0.7978845608028654 * (x + 0.044715 * x * x * x)))


def _layernorm(x, g, b, eps=1e-5):
    mu = jnp.mean(x, axis=-1, keepdims=True)
    var = jnp.mean((x - mu) ** 2, axis=-1, keepdims=True)
    return (x - mu) * jax.lax.rsqrt(var + eps) * g + b


def _last_eos_index(comet_input_ids):
    """Index of the last <eos> per row; falls back to the last position."""
    # TODO(synk): torch raises on inconsistent <eos> counts; wrapper checks
    # count-uniformity, missing-<eos> rows fall back to the final position.
    B, S = comet_input_ids.shape
    pos = jnp.arange(S)[None, :]
    eos = comet_input_ids == EOS_TOKEN_ID
    last = jnp.max(jnp.where(eos, pos, -1), axis=1)
    return jnp.where(last < 0, S - 1, last)


def _pick_tile_b(B, S, target_rows=512):
    """Batch-tile size: ~512 rows per grid step, at least 2 steps per branch."""
    tb = max(1, min(B, max(1, target_rows // max(S, 1))))
    while B % tb:
        tb -= 1
    if B >= 2 and B // tb < 2:
        tb = max(1, B // 2)
        while B % tb:
            tb -= 1
    return max(tb, 1)


# ----------------------------------------------------------------------------
# Kernel A: one transformer encoder layer + fused pooling.
#   grid = (branch, batch tile).  Weights are resident across the tile axis.
#   Emits only the pooled (CLS / last-<eos>) representation per tile.
# ----------------------------------------------------------------------------
def _make_encoder_kernel(f_chunk):
    def kernel(x_ref, mask_ref, sel_ref, wqkv_ref, wo_ref, wf1_ref, wf2_ref,
               vecs_ref, bf1_ref, pool_ref):
        bf16, f32 = jnp.bfloat16, jnp.float32

        x = x_ref[0]                       # (TB, S, H) f32
        m = mask_ref[0]                    # (TB, 1, S) f32 (1 = keep key pos)
        sel = sel_ref[0]                   # (TB, 1, S) f32 pooling one-hot
        TB, S, H = x.shape
        M = TB * S

        vecs = vecs_ref[0]                 # (9, H) f32 packed bias / LN vectors
        bq, bk, bv = vecs[0:1], vecs[1:2], vecs[2:3]
        bo = vecs[3:4]
        ln1g, ln1b = vecs[4:5], vecs[5:6]
        bf2 = vecs[6:7]
        ln2g, ln2b = vecs[7:8], vecs[8:9]
        bf1 = bf1_ref[0]                   # (1, F) f32

        xf = x.reshape(M, H)

        # Fused QKV projection: one (M, H) x (H, 3H) bf16 matmul.
        # 1/sqrt(H) attention scale is pre-folded into wq / bq at pack time.
        qkv = jnp.dot(xf.astype(bf16), wqkv_ref[0], preferred_element_type=f32)
        q = (qkv[:, 0:H] + bq).reshape(TB, S, H)
        k = (qkv[:, H:2 * H] + bk).reshape(TB, S, H)
        v = (qkv[:, 2 * H:3 * H] + bv).reshape(TB, S, H)

        # Scaled dot-product attention with additive key mask (per batch elem).
        scores = jnp.einsum("bqh,bkh->bqk", q.astype(bf16), k.astype(bf16),
                            preferred_element_type=f32)
        scores = scores - (1.0 - m) * 1e9
        scores = scores - jnp.max(scores, axis=-1, keepdims=True)
        p = jnp.exp(scores)
        p = p * pl.reciprocal(jnp.sum(p, axis=-1, keepdims=True), approx=True)

        ctx = jnp.einsum("bqk,bkh->bqh", p.astype(bf16), v.astype(bf16),
                         preferred_element_type=f32).reshape(M, H)
        attn = jnp.dot(ctx.astype(bf16), wo_ref[0], preferred_element_type=f32) + bo
        h = _layernorm(xf + attn, ln1g, ln1b)

        # Feed-forward, K-chunked over F: never materialize (M, F) in f32.
        hb = h.astype(bf16)
        F = wf1_ref.shape[-1]
        acc = jnp.zeros((M, H), f32)
        for ci in range(F // f_chunk):                 # static chunk loop
            lo = ci * f_chunk
            w1c = wf1_ref[0, :, lo:lo + f_chunk]       # (H, Fc) bf16, VMEM view
            w2c = wf2_ref[0, lo:lo + f_chunk, :]       # (Fc, H) bf16
            b1c = bf1[:, lo:lo + f_chunk]              # (1, Fc) f32
            fc = _gelu(jnp.dot(hb, w1c, preferred_element_type=f32) + b1c)
            acc = acc + jnp.dot(fc.astype(bf16), w2c, preferred_element_type=f32)
        y = _layernorm(h + acc + bf2, ln2g, ln2b)      # (M, H) f32

        # Fused pooling: (TB,1,S) one-hot x (TB,S,H) -> (TB,1,H) on the MXU.
        y3 = y.reshape(TB, S, H)
        pool_ref[0] = jnp.einsum("bqs,bsh->bqh", sel, y3,
                                 preferred_element_type=f32)

    return kernel


def encoder_pair_pooled(x2, mask2, sel2, enc, *, tile_b=None, f_chunk=None):
    """x2: (2,B,S,H) f32 stacked [roberta, comet] embeddings.
    mask2: (2,B,1,S) f32 key mask.  sel2: (2,B,1,S) f32 pooling one-hot
    (branch 0 = CLS position, branch 1 = last <eos>).
    Returns (2,B,1,H) f32 pooled representations."""
    _, B, S, H = x2.shape
    F = enc["wf1"].shape[-1]
    if tile_b is None:
        tile_b = _pick_tile_b(B, S)
    assert B % tile_b == 0
    if f_chunk is None:
        f_chunk = F if F <= 1024 else 1024
    assert F % f_chunk == 0
    n_bt = B // tile_b

    def bt(shape):       # per-(branch, batch-tile) data
        n = len(shape)
        return pl.BlockSpec((1,) + tuple(shape),
                            lambda c, t, n=n: (c, t) + (0,) * (n - 1))

    def br(shape):       # per-branch weights: index_map ignores the tile axis,
        n = len(shape)   # so the block stays resident across batch tiles.
        return pl.BlockSpec((1,) + tuple(shape),
                            lambda c, t, n=n: (c,) + (0,) * n)

    return pl.pallas_call(
        _make_encoder_kernel(f_chunk),
        out_shape=jax.ShapeDtypeStruct((2, B, 1, H), jnp.float32),
        grid=(2, n_bt),
        in_specs=[bt((tile_b, S, H)),        # x
                  bt((tile_b, 1, S)),        # key mask
                  bt((tile_b, 1, S)),        # pooling one-hot
                  br((H, 3 * H)),            # fused QKV weight (bf16)
                  br((H, H)),                # attention output weight (bf16)
                  br((H, F)),                # FFN in weight (bf16)
                  br((F, H)),                # FFN out weight (bf16)
                  br((9, H)),                # packed bias / LN vectors (f32)
                  br((1, F))],               # FFN bias (f32)
        out_specs=bt((tile_b, 1, H)),
        compiler_params=pltpu.CompilerParams(
            # Both axes independent; on v7x megacore shards the branch axis so
            # each TensorCore still gets a multi-step (tile) grid.
            dimension_semantics=("parallel", "parallel"),
            # TODO(synk): re-derive per generation at real model sizes
            # (<= ~48 MiB on v7x's 64 MiB VMEM, up to ~100 MiB on v5e/v6e).
            vmem_limit_bytes=48 * 1024 * 1024),
    )(x2, mask2, sel2, enc["wqkv"], enc["wo"], enc["wf1"], enc["wf2"],
      enc["vecs"], enc["bf1"])


# ----------------------------------------------------------------------------
# Kernel B: BartClassificationHead on the tiny pooled representations.
#   Input is (2, B, H) -- a few KiB -- instead of the full encoder output.
#   The feature concat is a split matmul: cls@W1a + rep@W1b.
#   Logits are computed into a lane-dense (B, 128*k) padded output.
# ----------------------------------------------------------------------------
def head_kernel(pool_ref, w1a_ref, w1b_ref, b1_ref, w2_ref, b2_ref, out_ref):
    bf16, f32 = jnp.bfloat16, jnp.float32
    cls = pool_ref[0]                      # (B, H) f32  (roberta CLS)
    rep = pool_ref[1]                      # (B, H) f32  (comet last <eos>)
    h = jnp.tanh(
        jnp.dot(cls.astype(bf16), w1a_ref[...], preferred_element_type=f32)
        + jnp.dot(rep.astype(bf16), w1b_ref[...], preferred_element_type=f32)
        + b1_ref[...])
    out_ref[...] = (jnp.dot(h.astype(bf16), w2_ref[...],
                            preferred_element_type=f32)
                    + b2_ref[...]).astype(out_ref.dtype)


def classification_head(pooled, head, num_labels, nl_pad):
    B = pooled.shape[1]
    vmem = lambda: pl.BlockSpec(memory_space=pltpu.MemorySpace.VMEM)
    out = pl.pallas_call(
        head_kernel,
        out_shape=jax.ShapeDtypeStruct((B, nl_pad), jnp.float32),
        in_specs=[vmem() for _ in range(6)],
        out_specs=vmem(),
    )(pooled, head["w1a"], head["w1b"], head["b1"], head["w2p"], head["b2p"])
    return out[:, :num_labels]


# ----------------------------------------------------------------------------
# One-time parameter packing (fused QKV, packed bias/LN vectors, bf16 casts,
# lane-dense padded classifier weight, 1/sqrt(H) folded into wq/bq).
# ----------------------------------------------------------------------------
def pack_params(params):
    bf16, f32 = jnp.bfloat16, jnp.float32
    rob_l, com_l = params["rob"]["layer"], params["com"]["layer"]
    H = rob_l["wq"].shape[0]
    scale = 1.0 / math.sqrt(H)

    def pack_layer(L):
        wqkv = jnp.concatenate([L["wq"] * scale, L["wk"], L["wv"]], axis=1)
        vecs = jnp.stack([L["bq"] * scale, L["bk"], L["bv"], L["bo"],
                          L["ln1g"], L["ln1b"], L["bf2"],
                          L["ln2g"], L["ln2b"]])
        return wqkv, L["wo"], L["wf1"], L["wf2"], vecs, L["bf1"][None, :]

    packs = [pack_layer(rob_l), pack_layer(com_l)]
    enc = {
        "wqkv": jnp.stack([p[0] for p in packs]).astype(bf16),   # (2,H,3H)
        "wo":   jnp.stack([p[1] for p in packs]).astype(bf16),   # (2,H,H)
        "wf1":  jnp.stack([p[2] for p in packs]).astype(bf16),   # (2,H,F)
        "wf2":  jnp.stack([p[3] for p in packs]).astype(bf16),   # (2,F,H)
        "vecs": jnp.stack([p[4] for p in packs]).astype(f32),    # (2,9,H)
        "bf1":  jnp.stack([p[5] for p in packs]).astype(f32),    # (2,1,F)
    }

    head = params["head"]
    num_labels = params["num_labels"]
    D = head["w1a"].shape[1]
    nl_pad = max(128, ((num_labels + 127) // 128) * 128)          # lane-dense
    w2p = jnp.zeros((D, nl_pad), f32).at[:, :num_labels].set(head["w2"])
    b2p = jnp.zeros((1, nl_pad), f32).at[0, :num_labels].set(head["b2"])
    packed_head = {
        "w1a": head["w1a"].astype(bf16), "w1b": head["w1b"].astype(bf16),
        "b1": head["b1"].reshape(1, -1).astype(f32),
        "w2p": w2p.astype(bf16), "b2p": b2p,
    }
    return {
        "num_labels": num_labels, "nl_pad": nl_pad,
        "rob_emb": {"tok": params["rob"]["tok_emb"], "pos": params["rob"]["pos_emb"]},
        "com_emb": {"tok": params["com"]["tok_emb"], "pos": params["com"]["pos_emb"]},
        "enc": enc, "head": packed_head,
    }


# ----------------------------------------------------------------------------
# Full RobertaComet forward (embedding lookup / loss are glue; hot paths are
# the two Pallas kernels above).
# ----------------------------------------------------------------------------
def roberta_comet_forward(packed, input_ids, attention_mask,
                          comet_input_ids, comet_attention_mask, labels=None):
    B, S = input_ids.shape
    assert comet_input_ids.shape == (B, S), \
        "stacked two-branch kernel expects matching (B, S)"
    # TODO(synk): unequal roberta/comet sequence lengths need wrapper padding.

    x_r = packed["rob_emb"]["tok"][input_ids] + packed["rob_emb"]["pos"][jnp.arange(S)][None]
    x_c = packed["com_emb"]["tok"][comet_input_ids] + packed["com_emb"]["pos"][jnp.arange(S)][None]
    x2 = jnp.stack([x_r, x_c])                                        # (2,B,S,H)
    mask2 = jnp.stack([attention_mask, comet_attention_mask]
                      ).astype(jnp.float32)[:, :, None, :]            # (2,B,1,S)

    # Pooling one-hots: branch 0 selects CLS (pos 0), branch 1 the last <eos>.
    last = _last_eos_index(comet_input_ids)                           # (B,)
    pos = jnp.arange(S)[None, :]
    cls_sel = jnp.broadcast_to(pos == 0, (B, S)).astype(jnp.float32)
    eos_sel = (pos == last[:, None]).astype(jnp.float32)
    sel2 = jnp.stack([cls_sel, eos_sel])[:, :, None, :]               # (2,B,1,S)

    pooled = encoder_pair_pooled(x2, mask2, sel2, packed["enc"])      # (2,B,1,H)
    pooled = pooled.reshape(2, B, -1)                                 # (2,B,H)

    logits = classification_head(pooled, packed["head"],
                                 packed["num_labels"], packed["nl_pad"])

    loss = None
    if labels is not None:
        logp = jax.nn.log_softmax(logits, axis=-1)
        loss = -jnp.mean(jnp.take_along_axis(logp, labels[:, None], axis=1))
    return loss, logits


# ----------------------------------------------------------------------------
# Pure-JAX reference mirroring the kernel math (bf16 matmuls, f32 elementwise).
# Unmirrored deviations: approx softmax reciprocal, 1/sqrt(H) folded into wq.
# ----------------------------------------------------------------------------
def _ref_encoder_layer(x, mask, p):
    bf, f32 = jnp.bfloat16, jnp.float32
    H = x.shape[-1]
    m = mask.astype(f32)[:, None, :]
    xb = x.astype(bf)
    q = jnp.dot(xb, p["wq"].astype(bf), preferred_element_type=f32) + p["bq"]
    k = jnp.dot(xb, p["wk"].astype(bf), preferred_element_type=f32) + p["bk"]
    v = jnp.dot(xb, p["wv"].astype(bf), preferred_element_type=f32) + p["bv"]
    scores = jnp.einsum("bqh,bkh->bqk", q.astype(bf), k.astype(bf),
                        preferred_element_type=f32) * (1.0 / math.sqrt(H))
    scores = scores + (1.0 - m) * -1e9
    pattn = jax.nn.softmax(scores, axis=-1)
    ctx = jnp.einsum("bqk,bkh->bqh", pattn.astype(bf), v.astype(bf),
                     preferred_element_type=f32)
    attn = jnp.dot(ctx.astype(bf), p["wo"].astype(bf),
                   preferred_element_type=f32) + p["bo"]
    h = _layernorm(x + attn, p["ln1g"], p["ln1b"])
    f = _gelu(jnp.dot(h.astype(bf), p["wf1"].astype(bf),
                      preferred_element_type=f32) + p["bf1"])
    f = jnp.dot(f.astype(bf), p["wf2"].astype(bf),
                preferred_element_type=f32) + p["bf2"]
    return _layernorm(h + f, p["ln2g"], p["ln2b"])


def _ref_forward(params, input_ids, attention_mask, comet_input_ids, comet_attention_mask):
    bf, f32 = jnp.bfloat16, jnp.float32
    B, S = input_ids.shape
    x_r = params["rob"]["tok_emb"][input_ids] + params["rob"]["pos_emb"][jnp.arange(S)][None]
    seq_out = _ref_encoder_layer(x_r, attention_mask, params["rob"]["layer"])
    x_c = params["com"]["tok_emb"][comet_input_ids] + params["com"]["pos_emb"][jnp.arange(S)][None]
    comet_h = _ref_encoder_layer(x_c, comet_attention_mask, params["com"]["layer"])

    last = _last_eos_index(comet_input_ids)
    rep = comet_h[jnp.arange(B), last]            # last <eos> hidden state
    cls = seq_out[:, 0, :]
    head = params["head"]
    h = jnp.tanh(jnp.dot(cls.astype(bf), head["w1a"].astype(bf), preferred_element_type=f32)
                 + jnp.dot(rep.astype(bf), head["w1b"].astype(bf), preferred_element_type=f32)
                 + head["b1"])
    return jnp.dot(h.astype(bf), head["w2"].astype(bf),
                   preferred_element_type=f32) + head["b2"]


# ----------------------------------------------------------------------------
# Deterministic parameter init (f32 master weights; packing/bf16 casts happen
# once in pack_params, not per forward).
# ----------------------------------------------------------------------------
def _init_layer(key, H, F):
    ks = jax.random.split(key, 16)
    w = lambda k, s: jax.random.normal(k, s, jnp.float32) * 0.02
    return {
        "wq": w(ks[0], (H, H)), "bq": w(ks[1], (H,)),
        "wk": w(ks[2], (H, H)), "bk": w(ks[3], (H,)),
        "wv": w(ks[4], (H, H)), "bv": w(ks[5], (H,)),
        "wo": w(ks[6], (H, H)), "bo": w(ks[7], (H,)),
        "ln1g": 1.0 + w(ks[8], (H,)), "ln1b": w(ks[9], (H,)),
        "wf1": w(ks[10], (H, F)), "bf1": w(ks[11], (F,)),
        "wf2": w(ks[12], (F, H)), "bf2": w(ks[13], (H,)),
        "ln2g": 1.0 + w(ks[14], (H,)), "ln2b": w(ks[15], (H,)),
    }


def init_params(key, vocab, S, Hr, Hc, F, num_labels):
    assert Hr == Hc, "stacked two-branch kernel expects equal hidden dims"
    k1, k2, k3, k4, k5, k6, k7, k8, k9, k10, k11 = jax.random.split(key, 11)
    D = Hr + Hc
    w = lambda k, s: jax.random.normal(k, s, jnp.float32) * 0.02
    return {
        "num_labels": num_labels,
        "rob": {"tok_emb": w(k1, (vocab, Hr)), "pos_emb": w(k2, (S, Hr)),
                "layer": _init_layer(k3, Hr, F)},
        "com": {"tok_emb": w(k4, (vocab, Hc)), "pos_emb": w(k5, (S, Hc)),
                "layer": _init_layer(k6, Hc, F)},
        "head": {"w1a": w(k7, (Hr, D)), "w1b": w(k8, (Hc, D)),
                 "b1": w(k9, (D,)),
                 "w2": w(k10, (D, num_labels)),
                 "b2": w(k11, (num_labels,))},
    }


if __name__ == "__main__":
    # Lane-dense toy shapes: H a multiple of 128 so vregs / MXU are fully used.
    # (S=8 key dim is lane-sparse for the softmax; benchmark at S>=128 -- this
    #  run is a correctness check.)
    B, S, H, F = 2, 8, 128, 256
    vocab, num_labels = 50, 3

    key = jax.random.PRNGKey(0)
    kp, k_ids, k_cids = jax.random.split(key, 3)
    params = init_params(kp, vocab, S, H, H, F, num_labels)
    packed = pack_params(params)     # one-time bf16 weight packing

    input_ids = jax.random.randint(k_ids, (B, S), 3, vocab, dtype=jnp.int32)
    attention_mask = jnp.ones((B, S), jnp.int32)

    comet_input_ids = jax.random.randint(k_cids, (B, S), 3, vocab, dtype=jnp.int32)
    comet_input_ids = comet_input_ids.at[:, -1].set(EOS_TOKEN_ID)  # one <eos>/row
    comet_attention_mask = jnp.ones((B, S), jnp.int32)
    labels = jnp.array([0, 2], dtype=jnp.int32)

    # torch code raises if examples have different numbers of <eos> tokens.
    eos_counts = np.asarray((comet_input_ids == EOS_TOKEN_ID).sum(axis=1))
    if len(np.unique(eos_counts)) > 1:
        raise ValueError("All examples must have the same number of <eos> tokens.")

    loss, logits = roberta_comet_forward(packed, input_ids, attention_mask,
                                         comet_input_ids, comet_attention_mask,
                                         labels=labels)
    logits = jax.block_until_ready(logits)
    loss = jax.block_until_ready(loss)

    ref_logits = jax.block_until_ready(
        _ref_forward(params, input_ids, attention_mask,
                     comet_input_ids, comet_attention_mask))

    # bf16 matmuls are mirrored in the reference; the only unmirrored ops are
    # the approximate softmax reciprocal and the pack-time 1/sqrt(H) fold, so a
    # modest tolerance suffices.
    np.testing.assert_allclose(np.asarray(logits), np.asarray(ref_logits),
                               rtol=2e-2, atol=2e-2)
    assert logits.shape == (B, num_labels)
    assert np.isfinite(np.asarray(loss)).all()
    print("KERNEL_OK")
</pallas_src>

<mosaic_0001>
module attributes {stable_mosaic.version = 11 : i64} {
  func.func @kernel(%arg0: i32, %arg1: i32, %arg2: memref<1x1x8x128xf32, #tpu.memory_space<vmem>>, %arg3: memref<1x1x1x8xf32, #tpu.memory_space<vmem>>, %arg4: memref<1x1x1x8xf32, #tpu.memory_space<vmem>>, %arg5: memref<1x128x384xbf16, #tpu.memory_space<vmem>>, %arg6: memref<1x128x128xbf16, #tpu.memory_space<vmem>>, %arg7: memref<1x128x256xbf16, #tpu.memory_space<vmem>>, %arg8: memref<1x256x128xbf16, #tpu.memory_space<vmem>>, %arg9: memref<1x9x128xf32, #tpu.memory_space<vmem>>, %arg10: memref<1x1x256xf32, #tpu.memory_space<vmem>>, %arg11: memref<1x1x1x128xf32, #tpu.memory_space<vmem>>) attributes {dimension_semantics = [#tpu.dimension_semantics<parallel>, #tpu.dimension_semantics<parallel>], iteration_bounds = array<i64: 2, 2>, scalar_prefetch = 0 : i64, scratch_operands = 0 : i64, tpu.core_type = #tpu.core_type<tc>, window_params = [{transform_indices = @transform_0, window_bounds = array<i64: 1, 1, 8, 128>}, {transform_indices = @transform_1, window_bounds = array<i64: 1, 1, 1, 8>}, {transform_indices = @transform_2, window_bounds = array<i64: 1, 1, 1, 8>}, {transform_indices = @transform_3, window_bounds = array<i64: 1, 128, 384>}, {transform_indices = @transform_4, window_bounds = array<i64: 1, 128, 128>}, {transform_indices = @transform_5, window_bounds = array<i64: 1, 128, 256>}, {transform_indices = @transform_6, window_bounds = array<i64: 1, 256, 128>}, {transform_indices = @transform_7, window_bounds = array<i64: 1, 9, 128>}, {transform_indices = @transform_8, window_bounds = array<i64: 1, 1, 256>}, {transform_indices = @transform_9, window_bounds = array<i64: 1, 1, 1, 128>}]} {
    %c0 = arith.constant 0 : index
    %c0_0 = arith.constant 0 : index
    %c0_1 = arith.constant 0 : index
    %c0_2 = arith.constant 0 : index
    %0 = vector.load %arg2[%c0, %c0_0, %c0_1, %c0_2] : memref<1x1x8x128xf32, #tpu.memory_space<vmem>>, vector<1x1x8x128xf32>
    %1 = vector.shape_cast %0 : vector<1x1x8x128xf32> to vector<1x8x128xf32>
    %c0_3 = arith.constant 0 : index
    %c0_4 = arith.constant 0 : index
    %c0_5 = arith.constant 0 : index
    %c0_6 = arith.constant 0 : index
    %2 = vector.load %arg3[%c0_3, %c0_4, %c0_5, %c0_6] : memref<1x1x1x8xf32, #tpu.memory_space<vmem>>, vector<1x1x1x8xf32>
    %3 = vector.shape_cast %2 : vector<1x1x1x8xf32> to vector<1x1x8xf32>
    %c0_7 = arith.constant 0 : index
    %c0_8 = arith.constant 0 : index
    %c0_9 = arith.constant 0 : index
    %c0_10 = arith.constant 0 : index
    %4 = vector.load %arg4[%c0_7, %c0_8, %c0_9, %c0_10] : memref<1x1x1x8xf32, #tpu.memory_space<vmem>>, vector<1x1x1x8xf32>
    %5 = vector.shape_cast %4 : vector<1x1x1x8xf32> to vector<1x1x8xf32>
    %c0_11 = arith.constant 0 : index
    %c0_12 = arith.constant 0 : index
    %c0_13 = arith.constant 0 : index
    %6 = vector.load %arg9[%c0_11, %c0_12, %c0_13] : memref<1x9x128xf32, #tpu.memory_space<vmem>>, vector<1x9x128xf32>
    %7 = vector.shape_cast %6 : vector<1x9x128xf32> to vector<9x128xf32>
    %8 = vector.extract_strided_slice %7 {offsets = [0, 0], sizes = [1, 128], strides = [1, 1]} : vector<9x128xf32> to vector<1x128xf32>
    %9 = vector.extract_strided_slice %7 {offsets = [1, 0], sizes = [1, 128], strides = [1, 1]} : vector<9x128xf32> to vector<1x128xf32>
    %10 = vector.extract_strided_slice %7 {offsets = [2, 0], sizes = [1, 128], strides = [1, 1]} : vector<9x128xf32> to vector<1x128xf32>
    %11 = vector.extract_strided_slice %7 {offsets = [3, 0], sizes = [1, 128], strides = [1, 1]} : vector<9x128xf32> to vector<1x128xf32>
    %12 = vector.extract_strided_slice %7 {offsets = [4, 0], sizes = [1, 128], strides = [1, 1]} : vector<9x128xf32> to vector<1x128xf32>
    %13 = vector.extract_strided_slice %7 {offsets = [5, 0], sizes = [1, 128], strides = [1, 1]} : vector<9x128xf32> to vector<1x128xf32>
    %14 = vector.extract_strided_slice %7 {offsets = [6, 0], sizes = [1, 128], strides = [1, 1]} : vector<9x128xf32> to vector<1x128xf32>
    %15 = vector.extract_strided_slice %7 {offsets = [7, 0], sizes = [1, 128], strides = [1, 1]} : vector<9x128xf32> to vector<1x128xf32>
    %16 = vector.extract_strided_slice %7 {offsets = [8, 0], sizes = [1, 128], strides = [1, 1]} : vector<9x128xf32> to vector<1x128xf32>
    %c0_14 = arith.constant 0 : index
    %c0_15 = arith.constant 0 : index
    %c0_16 = arith.constant 0 : index
    %17 = vector.load %arg10[%c0_14, %c0_15, %c0_16] : memref<1x1x256xf32, #tpu.memory_space<vmem>>, vector<1x1x256xf32>
    %18 = vector.shape_cast %17 : vector<1x1x256xf32> to vector<1x256xf32>
    %19 = vector.shape_cast %1 : vector<1x8x128xf32> to vector<8x128xf32>
    %20 = arith.truncf %19 : vector<8x128xf32> to vector<8x128xbf16>
    %c0_17 = arith.constant 0 : index
    %c0_18 = arith.constant 0 : index
    %c0_19 = arith.constant 0 : index
    %21 = vector.load %arg5[%c0_17, %c0_18, %c0_19] : memref<1x128x384xbf16, #tpu.memory_space<vmem>>, vector<1x128x384xbf16>
    %22 = vector.shape_cast %21 : vector<1x128x384xbf16> to vector<128x384xbf16>
    %cst = arith.constant dense<0.000000e+00> : vector<8x384xf32>
    %23 = tpu.matmul %20, %22, %cst {dimension_numbers = #tpu.dot_dimension_numbers<[1], [0], [0], [1], [0, 0, 1, 1], [], []>} : vector<8x128xbf16>, vector<128x384xbf16>, vector<8x384xf32> -> vector<8x384xf32>
    %24 = vector.extract_strided_slice %23 {offsets = [0, 0], sizes = [8, 128], strides = [1, 1]} : vector<8x384xf32> to vector<8x128xf32>
    %25 = vector.broadcast %8 : vector<1x128xf32> to vector<8x128xf32>
    %26 = arith.addf %24, %25 : vector<8x128xf32>
    %27 = vector.shape_cast %26 : vector<8x128xf32> to vector<1x8x128xf32>
    %28 = vector.extract_strided_slice %23 {offsets = [0, 128], sizes = [8, 128], strides = [1, 1]} : vector<8x384xf32> to vector<8x128xf32>
    %29 = vector.broadcast %9 : vector<1x128xf32> to vector<8x128xf32>
    %30 = arith.addf %28, %29 : vector<8x128xf32>
    %31 = vector.shape_cast %30 : vector<8x128xf32> to vector<1x8x128xf32>
    %32 = vector.extract_strided_slice %23 {offsets = [0, 256], sizes = [8, 128], strides = [1, 1]} : vector<8x384xf32> to vector<8x128xf32>
    %33 = vector.broadcast %10 : vector<1x128xf32> to vector<8x128xf32>
    %34 = arith.addf %32, %33 : vector<8x128xf32>
    %35 = vector.shape_cast %34 : vector<8x128xf32> to vector<1x8x128xf32>
    %36 = arith.truncf %27 : vector<1x8x128xf32> to vector<1x8x128xbf16>
    %37 = arith.truncf %31 : vector<1x8x128xf32> to vector<1x8x128xbf16>
    "tpu.trace_start"() <{level = 10 : i32, message = "bqh,bkh->bqk"}> : () -> ()
    %cst_20 = arith.constant dense<0.000000e+00> : vector<1x8x8xf32>
    %38 = tpu.matmul %36, %37, %cst_20 {dimension_numbers = #tpu.dot_dimension_numbers<[2], [2], [1], [1], [0, 0, 0, 1, 1, 1], [0], [0]>} : vector<1x8x128xbf16>, vector<1x8x128xbf16>, vector<1x8x8xf32> -> vector<1x8x8xf32>
    "tpu.trace_stop"() : () -> ()
    %cst_21 = arith.constant 1.000000e+00 : f32
    %39 = vector.broadcast %cst_21 : f32 to vector<1x1x8xf32>
    %40 = arith.subf %39, %3 : vector<1x1x8xf32>
    %cst_22 = arith.constant 1.000000e+09 : f32
    %41 = vector.broadcast %cst_22 : f32 to vector<1x1x8xf32>
    %42 = arith.mulf %40, %41 : vector<1x1x8xf32>
    %43 = vector.broadcast %42 : vector<1x1x8xf32> to vector<1x8x8xf32>
    %44 = arith.subf %38, %43 : vector<1x8x8xf32>
    %cst_23 = arith.constant dense<0xFF800000> : vector<1x8xf32>
    %45 = vector.multi_reduction <maximumf>, %44, %cst_23 [2] : vector<1x8x8xf32> to vector<1x8xf32>
    %46 = vector.shape_cast %45 : vector<1x8xf32> to vector<1x8x1xf32>
    %47 = vector.broadcast %46 : vector<1x8x1xf32> to vector<1x8x8xf32>
    %48 = arith.subf %44, %47 : vector<1x8x8xf32>
    %49 = math.exp %48 : vector<1x8x8xf32>
    %cst_24 = arith.constant dense<0.000000e+00> : vector<1x8xf32>
    %50 = vector.multi_reduction <add>, %49, %cst_24 [2] : vector<1x8x8xf32> to vector<1x8xf32>
    %51 = vector.shape_cast %50 : vector<1x8xf32> to vector<1x8x1xf32>
    %52 = tpu.reciprocal %51 {approx = true} : vector<1x8x1xf32> -> vector<1x8x1xf32>
    %53 = vector.broadcast %52 : vector<1x8x1xf32> to vector<1x8x8xf32>
    %54 = arith.mulf %49, %53 : vector<1x8x8xf32>
    %55 = arith.truncf %54 : vector<1x8x8xf32> to vector<1x8x8xbf16>
    %56 = arith.truncf %35 : vector<1x8x128xf32> to vector<1x8x128xbf16>
    "tpu.trace_start"() <{level = 10 : i32, message = "bqk,bkh->bqh"}> : () -> ()
    %cst_25 = arith.constant dense<0.000000e+00> : vector<1x8x128xf32>
    %57 = tpu.matmul %55, %56, %cst_25 {dimension_numbers = #tpu.dot_dimension_numbers<[2], [1], [1], [2], [0, 0, 0, 1, 1, 2], [0], [0]>} : vector<1x8x8xbf16>, vector<1x8x128xbf16>, vector<1x8x128xf32> -> vector<1x8x128xf32>
    "tpu.trace_stop"() : () -> ()
    %58 = vector.shape_cast %57 : vector<1x8x128xf32> to vector<8x128xf32>
    %59 = arith.truncf %58 : vector<8x128xf32> to vector<8x128xbf16>
    %c0_26 = arith.constant 0 : index
    %c0_27 = arith.constant 0 : index
    %c0_28 = arith.constant 0 : index
    %60 = vector.load %arg6[%c0_26, %c0_27, %c0_28] : memref<1x128x128xbf16, #tpu.memory_space<vmem>>, vector<1x128x128xbf16>
    %61 = vector.shape_cast %60 : vector<1x128x128xbf16> to vector<128x128xbf16>
    %cst_29 = arith.constant dense<0.000000e+00> : vector<8x128xf32>
    %62 = tpu.matmul %59, %61, %cst_29 {dimension_numbers = #tpu.dot_dimension_numbers<[1], [0], [0], [1], [0, 0, 1, 1], [], []>} : vector<8x128xbf16>, vector<128x128xbf16>, vector<8x128xf32> -> vector<8x128xf32>
    %63 = vector.broadcast %11 : vector<1x128xf32> to vector<8x128xf32>
    %64 = arith.addf %62, %63 : vector<8x128xf32>
    %65 = arith.addf %19, %64 : vector<8x128xf32>
    %cst_30 = arith.constant dense<0.000000e+00> : vector<8xf32>
    %66 = vector.multi_reduction <add>, %65, %cst_30 [1] : vector<8x128xf32> to vector<8xf32>
    %67 = vector.shape_cast %66 : vector<8xf32> to vector<8x1xf32>
    %cst_31 = arith.constant 1.280000e+02 : f32
    %68 = vector.broadcast %cst_31 : f32 to vector<8x1xf32>
    %69 = arith.divf %67, %68 : vector<8x1xf32>
    %70 = vector.broadcast %69 : vector<8x1xf32> to vector<8x128xf32>
    %71 = arith.subf %65, %70 : vector<8x128xf32>
    %72 = arith.mulf %71, %71 : vector<8x128xf32>
    %cst_32 = arith.constant dense<0.000000e+00> : vector<8xf32>
    %73 = vector.multi_reduction <add>, %72, %cst_32 [1] : vector<8x128xf32> to vector<8xf32>
    %74 = vector.shape_cast %73 : vector<8xf32> to vector<8x1xf32>
    %cst_33 = arith.constant 1.280000e+02 : f32
    %75 = vector.broadcast %cst_33 : f32 to vector<8x1xf32>
    %76 = arith.divf %74, %75 : vector<8x1xf32>
    %77 = vector.broadcast %69 : vector<8x1xf32> to vector<8x128xf32>
    %78 = arith.subf %65, %77 : vector<8x128xf32>
    %cst_34 = arith.constant 9.99999974E-6 : f32
    %79 = vector.broadcast %cst_34 : f32 to vector<8x1xf32>
    %80 = arith.addf %76, %79 : vector<8x1xf32>
    %81 = math.rsqrt %80 : vector<8x1xf32>
    %82 = vector.broadcast %81 : vector<8x1xf32> to vector<8x128xf32>
    %83 = arith.mulf %78, %82 : vector<8x128xf32>
    %84 = vector.broadcast %12 : vector<1x128xf32> to vector<8x128xf32>
    %85 = arith.mulf %83, %84 : vector<8x128xf32>
    %86 = vector.broadcast %13 : vector<1x128xf32> to vector<8x128xf32>
    %87 = arith.addf %85, %86 : vector<8x128xf32>
    %88 = arith.truncf %87 : vector<8x128xf32> to vector<8x128xbf16>
    %cst_35 = arith.constant 0.000000e+00 : f32
    %89 = vector.broadcast %cst_35 : f32 to vector<8x128xf32>
    %c0_36 = arith.constant 0 : index
    %c0_37 = arith.constant 0 : index
    %c0_38 = arith.constant 0 : index
    %90 = vector.load %arg7[%c0_36, %c0_37, %c0_38] : memref<1x128x256xbf16, #tpu.memory_space<vmem>>, vector<1x128x256xbf16>
    %91 = vector.shape_cast %90 : vector<1x128x256xbf16> to vector<128x256xbf16>
    %c0_39 = arith.constant 0 : index
    %c0_40 = arith.constant 0 : index
    %c0_41 = arith.constant 0 : index
    %92 = vector.load %arg8[%c0_39, %c0_40, %c0_41] : memref<1x256x128xbf16, #tpu.memory_space<vmem>>, vector<1x256x128xbf16>
    %93 = vector.shape_cast %92 : vector<1x256x128xbf16> to vector<256x128xbf16>
    %cst_42 = arith.constant dense<0.000000e+00> : vector<8x256xf32>
    %94 = tpu.matmul %88, %91, %cst_42 {dimension_numbers = #tpu.dot_dimension_numbers<[1], [0], [0], [1], [0, 0, 1, 1], [], []>} : vector<8x128xbf16>, vector<128x256xbf16>, vector<8x256xf32> -> vector<8x256xf32>
    %95 = vector.broadcast %18 : vector<1x256xf32> to vector<8x256xf32>
    %96 = arith.addf %94, %95 : vector<8x256xf32>
    %cst_43 = arith.constant 5.000000e-01 : f32
    %97 = vector.broadcast %cst_43 : f32 to vector<8x256xf32>
    %98 = arith.mulf %97, %96 : vector<8x256xf32>
    %cst_44 = arith.constant 4.471500e-02 : f32
    %99 = vector.broadcast %cst_44 : f32 to vector<8x256xf32>
    %100 = arith.mulf %99, %96 : vector<8x256xf32>
    %101 = arith.mulf %100, %96 : vector<8x256xf32>
    %102 = arith.mulf %101, %96 : vector<8x256xf32>
    %103 = arith.addf %96, %102 : vector<8x256xf32>
    %cst_45 = arith.constant 0.797884583 : f32
    %104 = vector.broadcast %cst_45 : f32 to vector<8x256xf32>
    %105 = arith.mulf %104, %103 : vector<8x256xf32>
    %106 = math.tanh %105 : vector<8x256xf32>
    %cst_46 = arith.constant 1.000000e+00 : f32
    %107 = vector.broadcast %cst_46 : f32 to vector<8x256xf32>
    %108 = arith.addf %107, %106 : vector<8x256xf32>
    %109 = arith.mulf %98, %108 : vector<8x256xf32>
    %110 = arith.truncf %109 : vector<8x256xf32> to vector<8x256xbf16>
    %cst_47 = arith.constant dense<0.000000e+00> : vector<8x128xf32>
    %111 = tpu.matmul %110, %93, %cst_47 {dimension_numbers = #tpu.dot_dimension_numbers<[1], [0], [0], [1], [0, 0, 1, 1], [], []>} : vector<8x256xbf16>, vector<256x128xbf16>, vector<8x128xf32> -> vector<8x128xf32>
    %112 = arith.addf %89, %111 : vector<8x128xf32>
    %113 = arith.addf %87, %112 : vector<8x128xf32>
    %114 = vector.broadcast %14 : vector<1x128xf32> to vector<8x128xf32>
    %115 = arith.addf %113, %114 : vector<8x128xf32>
    %cst_48 = arith.constant dense<0.000000e+00> : vector<8xf32>
    %116 = vector.multi_reduction <add>, %115, %cst_48 [1] : vector<8x128xf32> to vector<8xf32>
    %117 = vector.shape_cast %116 : vector<8xf32> to vector<8x1xf32>
    %cst_49 = arith.constant 1.280000e+02 : f32
    %118 = vector.broadcast %cst_49 : f32 to vector<8x1xf32>
    %119 = arith.divf %117, %118 : vector<8x1xf32>
    %120 = vector.broadcast %119 : vector<8x1xf32> to vector<8x128xf32>
    %121 = arith.subf %115, %120 : vector<8x128xf32>
    %122 = arith.mulf %121, %121 : vector<8x128xf32>
    %cst_50 = arith.constant dense<0.000000e+00> : vector<8xf32>
    %123 = vector.multi_reduction <add>, %122, %cst_50 [1] : vector<8x128xf32> to vector<8xf32>
    %124 = vector.shape_cast %123 : vector<8xf32> to vector<8x1xf32>
    %cst_51 = arith.constant 1.280000e+02 : f32
    %125 = vector.broadcast %cst_51 : f32 to vector<8x1xf32>
    %126 = arith.divf %124, %125 : vector<8x1xf32>
    %127 = vector.broadcast %119 : vector<8x1xf32> to vector<8x128xf32>
    %128 = arith.subf %115, %127 : vector<8x128xf32>
    %cst_52 = arith.constant 9.99999974E-6 : f32
    %129 = vector.broadcast %cst_52 : f32 to vector<8x1xf32>
    %130 = arith.addf %126, %129 : vector<8x1xf32>
    %131 = math.rsqrt %130 : vector<8x1xf32>
    %132 = vector.broadcast %131 : vector<8x1xf32> to vector<8x128xf32>
    %133 = arith.mulf %128, %132 : vector<8x128xf32>
    %134 = vector.broadcast %15 : vector<1x128xf32> to vector<8x128xf32>
    %135 = arith.mulf %133, %134 : vector<8x128xf32>
    %136 = vector.broadcast %16 : vector<1x128xf32> to vector<8x128xf32>
    %137 = arith.addf %135, %136 : vector<8x128xf32>
    %138 = vector.shape_cast %137 : vector<8x128xf32> to vector<1x8x128xf32>
    "tpu.trace_start"() <{level = 10 : i32, message = "bqs,bsh->bqh"}> : () -> ()
    %cst_53 = arith.constant dense<0.000000e+00> : vector<1x1x128xf32>
    %139 = tpu.matmul %5, %138, %cst_53 {dimension_numbers = #tpu.dot_dimension_numbers<[2], [1], [1], [2], [0, 0, 0, 1, 1, 2], [0], [0]>} : vector<1x1x8xf32>, vector<1x8x128xf32>, vector<1x1x128xf32> -> vector<1x1x128xf32>
    "tpu.trace_stop"() : () -> ()
    %c0_54 = arith.constant 0 : index
    %c0_55 = arith.constant 0 : index
    %c0_56 = arith.constant 0 : index
    %c0_57 = arith.constant 0 : index
    %140 = vector.load %arg11[%c0_54, %c0_55, %c0_56, %c0_57] : memref<1x1x1x128xf32, #tpu.memory_space<vmem>>, vector<1x1x1x128xf32>
    %141 = vector.shape_cast %140 : vector<1x1x1x128xf32> to vector<1x1x128xf32>
    %142 = vector.shape_cast %139 : vector<1x1x128xf32> to vector<1x1x1x128xf32>
    tpu.vector_store %arg11[%c0_54, %c0_55, %c0_56, %c0_57], %142 {strides = array<i32>} : memref<1x1x1x128xf32, #tpu.memory_space<vmem>>, vector<1x1x1x128xf32>,
    return
  }
  func.func @transform_0(%arg0: i32, %arg1: i32) -> (i32, i32, i32, i32) {
    %c0_i32 = arith.constant 0 : i32
    %c0_i32_0 = arith.constant 0 : i32
    %c0_i32_1 = arith.constant 0 : i32
    return %arg0, %arg1, %c0_i32, %c0_i32_0 : i32, i32, i32, i32
  }
  func.func @transform_1(%arg0: i32, %arg1: i32) -> (i32, i32, i32, i32) {
    %c0_i32 = arith.constant 0 : i32
    %c0_i32_0 = arith.constant 0 : i32
    %c0_i32_1 = arith.constant 0 : i32
    return %arg0, %arg1, %c0_i32, %c0_i32_0 : i32, i32, i32, i32
  }
  func.func @transform_2(%arg0: i32, %arg1: i32) -> (i32, i32, i32, i32) {
    %c0_i32 = arith.constant 0 : i32
    %c0_i32_0 = arith.constant 0 : i32
    %c0_i32_1 = arith.constant 0 : i32
    return %arg0, %arg1, %c0_i32, %c0_i32_0 : i32, i32, i32, i32
  }
  func.func @transform_3(%arg0: i32, %arg1: i32) -> (i32, i32, i32) {
    %c0_i32 = arith.constant 0 : i32
    %c0_i32_0 = arith.constant 0 : i32
    %c0_i32_1 = arith.constant 0 : i32
    return %arg0, %c0_i32, %c0_i32_0 : i32, i32, i32
  }
  func.func @transform_4(%arg0: i32, %arg1: i32) -> (i32, i32, i32) {
    %c0_i32 = arith.constant 0 : i32
    %c0_i32_0 = arith.constant 0 : i32
    %c0_i32_1 = arith.constant 0 : i32
    return %arg0, %c0_i32, %c0_i32_0 : i32, i32, i32
  }
  func.func @transform_5(%arg0: i32, %arg1: i32) -> (i32, i32, i32) {
    %c0_i32 = arith.constant 0 : i32
    %c0_i32_0 = arith.constant 0 : i32
    %c0_i32_1 = arith.constant 0 : i32
    return %arg0, %c0_i32, %c0_i32_0 : i32, i32, i32
  }
  func.func @transform_6(%arg0: i32, %arg1: i32) -> (i32, i32, i32) {
    %c0_i32 = arith.constant 0 : i32
    %c0_i32_0 = arith.constant 0 : i32
    %c0_i32_1 = arith.constant 0 : i32
    return %arg0, %c0_i32, %c0_i32_0 : i32, i32, i32
  }
  func.func @transform_7(%arg0: i32, %arg1: i32) -> (i32, i32, i32) {
    %c0_i32 = arith.constant 0 : i32
    %c0_i32_0 = arith.constant 0 : i32
    %c0_i32_1 = arith.constant 0 : i32
    return %arg0, %c0_i32, %c0_i32_0 : i32, i32, i32
  }
  func.func @transform_8(%arg0: i32, %arg1: i32) -> (i32, i32, i32) {
    %c0_i32 = arith.constant 0 : i32
    %c0_i32_0 = arith.constant 0 : i32
    %c0_i32_1 = arith.constant 0 : i32
    return %arg0, %c0_i32, %c0_i32_0 : i32, i32, i32
  }
  func.func @transform_9(%arg0: i32, %arg1: i32) -> (i32, i32, i32, i32) {
    %c0_i32 = arith.constant 0 : i32
    %c0_i32_0 = arith.constant 0 : i32
    %c0_i32_1 = arith.constant 0 : i32
    return %arg0, %arg1, %c0_i32, %c0_i32_0 : i32, i32, i32, i32
  }
}

</mosaic_0001>

<bundles_post_ra>
// kernel: tpu_custom_call.1
= control target key start
LH: loop header
LB: loop body
LE: loop exit
PB: predicated region body
PF: predicated region fallthrough
CT: control target
= control target key end

     0   :  { %s2793_s0 = inlined_call_operand.vmem [shape: f32[2,2,8,128], index: 0, kind: input, shape index: {}]   ;;  %s2794_s1 = inlined_call_operand.vmem [shape: f32[2,2,1,8], index: 1, kind: input, shape index: {}]   ;;  %s2795_s2 = inlined_call_operand.vmem [shape: f32[2,2,1,8], index: 2, kind: input, shape index: {}]   ;;  %s2796_s3 = inlined_call_operand.hbm [shape: bf16[2,128,384], index: 3, kind: input, shape index: {}]   ;;  %s2797_s4 = inlined_call_operand.hbm [shape: bf16[2,128,128], index: 4, kind: input, shape index: {}]   ;;  %s2798_s5 = inlined_call_operand.hbm [shape: bf16[2,128,256], index: 5, kind: input, shape index: {}]   ;;  %s2799_s6 = inlined_call_operand.hbm [shape: bf16[2,256,128], index: 6, kind: input, shape index: {}]   ;;  %s2800_s7 = inlined_call_operand.vmem [shape: f32[2,9,128], index: 7, kind: input, shape index: {}]   ;;  %s2801_s8 = inlined_call_operand.vmem [shape: f32[2,1,256], index: 8, kind: input, shape index: {}]   ;;  %s2802_s9 = inlined_call_operand.hbm [shape: f32[2,2,1,128], index: 9, kind: output, shape index: {}]  }
   0x1   :  { %2818 = sst [smem:[#allocation27_spill]] %s2794_s1 }
   0x2   :  { %2819 = sst [smem:[#allocation28_spill]] %s2795_s2 }
   0x3   :  { %2820 = sst [smem:[#allocation29_spill]] %s2796_s3 }
   0x4   :  { %2821 = sst [smem:[#allocation30_spill]] %s2797_s4 }
   0x5   :  { %2822 = sst [smem:[#allocation31_spill]] %s2801_s8 }
   0x6   :  { %2823 = sst [smem:[#allocation32_spill]] %s2802_s9 }
   0x7   :  { %14 = vsyncpa [#allocation3], 0 }
   0x8   :  { %16 = vsyncpa [#allocation3 + $0x1], 0 }
   0x9   :  { %17 = vsyncpa [#allocation6], 0 }
   0xa   :  { %19 = vsyncpa [#allocation6 + $0x1], 0 }
   0xb   :  { %20 = vsyncpa [#allocation9], 0 }
   0xc   :  { %22 = vsyncpa [#allocation9 + $0x1], 0 }
   0xd   :  { %23 = vsyncpa [#allocation4], 0 }
   0xe   :  { %25 = vsyncpa [#allocation4 + $0x1], 0  ;;  %s2382_s30 = smov 0   ;;  %s2384_s10 = smov 0  }
   0xf   :  { %s2386_s11 = smov 0   ;;  %s2388_s12 = smov 0  }
  0x10   :  { %s2390_s13 = smov 0   ;;  %s2392_s14 = smov 0  }
  0x11   :  { %s2394_s15 = smov 0   ;;  %s2396_s16 = smov 0  }
  0x12   :  { %s2398_s17 = smov 0   ;;  %s2400_s18 = smov 0  }
  0x13   :  { %s2402_s19 = smov 0  }
  0x14 LB: > { %2824 = sst [smem:[#allocation15_spill]] %s2283_s30  ;;  %s2436_s20 = sadd.s32 4294967295, %s2323_s19   ;;  %s2323_s19 = sphi %s2402_s19, %s31_s19   ;;  %s2319_s18 = sphi %s2400_s18, %s2866_s18   ;;  %s2315_s17 = sphi %s2398_s17, %s2861_s17   ;;  %s2311_s16 = sphi %s2396_s16, %s2865_s16   ;;  %s2307_s15 = sphi %s2394_s15, %s2860_s15   ;;  %s2303_s14 = sphi %s2392_s14, %s2859_s14   ;;  %s2299_s13 = sphi %s2390_s13, %s2864_s13   ;;  %s2295_s12 = sphi %s2388_s12, %s2863_s12   ;;  %s2291_s11 = sphi %s2386_s11, %s2857_s11   ;;  %s2287_s10 = sphi %s2384_s10, %s2856_s10   ;;  %s2283_s30 = sphi %s2382_s30, %s2855_s30  }
  0x15   : > { %2825 = sst [smem:[#allocation16_spill]] %s2287_s10  ;;  %s1578_s21 = sadd.s32 4294967294, %s2323_s19  }
  0x16   : > { %2826 = sst [smem:[#allocation17_spill]] %s2291_s11  ;;  %s40_s22 = sadd.s32 1, %s2315_s17 }
  0x17   : > { %2827 = sst [smem:[#allocation18_spill]] %s2303_s14  ;;  %s43_s23 = sadd.s32 1, %s2319_s18 }
  0x18   : > { %2828 = sst [smem:[#allocation19_spill]] %s2315_s17  ;;  %p41_p0 = scmp.ge.s32.totalorder %s40_s22, 2 }
  0x19   : > { %2829 = sst [smem:[#allocation20_spill]] %s2323_s19  ;;  %s134_s24 = sadd.s32 1, %s2303_s14 }
  0x1a   : > { %p141_p1 = scmp.ne.s32.totalorder %s2303_s14, %s2299_s13  ;;  %p142_p2 = scmp.eq.s32.totalorder %s2323_s19, 0 }
  0x1b   : > { %s2868_s22 = smov (%p41_p0, %s40_s22), 0  ;;  %s2870_s23 = smov (!%p41_p0, %s43_s23), %s2319_s18 }
  0x1c   : > { %2830 = sst [smem:[#allocation21_spill]] %s2868_s22  ;;  %p2448_p3 = por %p142_p2, %p141_p1 }
  0x1d   : > { %p147_p4 = scmp.ne.s32.totalorder %s2299_s13, %s2295_s12  ;;  %p45_p5 = scmp.ge.s32.totalorder %s2870_s23, 2 }
  0x1e   : > { %p148_p6 = scmp.eq.s32.totalorder %s2436_s20, 0  ;;  %s288_s26 = ssub.s32 %s2315_s17, %s2868_s22 }
  0x1f   : > { %s292_s27 = sadd.s32 1, %s2291_s11  ;;  %s2872_s23 = smov (%p45_p5, %s2870_s23), 0 }
  0x20   : > { %2832 = sst [smem:[#allocation22_spill]] %s2872_s23  ;;  %p2459_p7 = por %p148_p6, %p147_p4 }
  0x21   : > { %p302_p8 = scmp.ne.s32.totalorder %s2291_s11, %s2287_s10  ;;  %s131_s29 = ssub.s32 %s2319_s18, %s2872_s23 }
  0x22   : > { %p303_p9 = scmp.eq.s32.totalorder %s2436_s20, 3  ;;  %p132_p10 = scmp.eq.s32.totalorder %s131_s29, 0 }
  0x23   : > { %s289_s12 = sor.u32 %s288_s26, %s131_s29  ;;  %p308_p13 = scmp.ne.s32.totalorder %s2287_s10, %s2283_s30 }
  0x24   : > { %p290_p11 = scmp.eq.s32.totalorder %s289_s12, 0  ;;  %p2468_p12 = por %p303_p9, %p302_p8 }
  0x25   : > { %s2473_s17 = scalar_select %p132_p10, %s2303_s14, %s134_s24  }
  0x26   : > { %s2834_s22 = scalar_select %p2468_p12, 1, 0 }
  0x27   : > { %2836 = sst [smem:[#allocation24_spill]] %s2473_s17  ;;  %p309_p0 = scmp.eq.s32.totalorder %s1578_s21, 3 }
  0x28   : > { %2835 = sst [smem:[#allocation23_spill]] %s2834_s22  ;;  %p1961_p1 = scmp.lt.s32.totalorder %s2323_s19, 4 }
  0x29   : > { %s2476_s9 = scalar_select %p290_p11, %s2291_s11, %s292_s27  }
  0x2a   : > { %p2481_p2 = por %p309_p0, %p308_p13  ;;  %s2486_s23 = sand.u32 1, %s2303_s14  }
  0x2b   : > { %2837 = sst [smem:[#allocation25_spill]] %s2476_s9  ;;  %p2490_p4 = pnand %p1961_p1, %p2448_p3 }
  0x2c   : > { %s2838_s2 = scalar_select %p2481_p2, 1, 0 }
  0x2d   : > { %s382_s24 = sand.u32 1, %s2323_s19   ;;  %s1582_s27 = sshll.u32 %s2486_s23, 6 }
  0x2e   : > { %2839 = sst [smem:[#allocation26_spill]] %s2838_s2  ;;  %s1863_s21 = sshll.u32 %s2319_s18, 6 }
  0x2f   : > { %s386_s29 = scalar_lea.vmem [#allocation5], %s1582_s27  ;;  %s2841_s4 = sld [smem:[#allocation30_spill]] }
  0x30   : > { %s394_s12 = sshll.u32 %s386_s29, 4  ;;  %s2500_s11 = scalar_lea.sflag [#allocation6], %s382_s24  ;;  %s395_s12 = int_to_ptr.vmem [resolvable:$true] %s394_s12 }
  0x31   : > { %s2814_s2 = smov 64   ;;  %s2815_s30 = smov 4  }
  0x32   : > { %p1591_p3 = scmp.ge.s32.totalorder %s2323_s19, 1  ;;  %p461_p5 = scmp.lt.s32.totalorder %s2323_s19, 5 }
  0x33   : > { %s1932_s17 = smul.u32 192, %s2319_s18  ;;  %s1585_s24 = sshll.u32 %s2486_s23, 7 }
  0x34   : > { %p2510_p6 = pnand %p1591_p3, %p461_p5  ;;  %s2843_s3 = sld [smem:[#allocation29_spill]] }
  0x35   : > { %s391_s14 = scalar_lea.hbm %s2841_s4, %s1863_s21  ;;  %s408_s19 = scalar_lea.vmem [#allocation7], %s1585_s24 }
  0x36   : > { %s392_s25 = sshll.u32 %s391_s14, 4  ;;  %s1931_s14 = smul.u32 192, %s2486_s23  ;;  %s393_s25 = int_to_ptr.hbm [resolvable:$true] %s392_s25 }
  0x37   : > { %1950 = dma.hbm_to_vmem [thread:$0]  (!%p2490_p4), %s393_s25, 1024, %s395_s12, %s2500_s11, %s2814_s2, %s2814_s2, %s2815_s30  }
  0x38   : > { %s364_s4 = scalar_lea.vmem [#allocation2], %s1931_s14  ;;  %s361_s12 = scalar_lea.sflag [#allocation3], %s2486_s23 }
  0x39   : > { %s372_s22 = sshll.u32 %s364_s4, 4  ;;  %s2327_s25 = smov 192   ;;  %s373_s22 = int_to_ptr.vmem [resolvable:$true] %s372_s22 }
  0x3a   : > { %s369_s29 = scalar_lea.hbm %s2843_s3, %s1932_s17  ;;  %s2328_s2 = smov 12  }
  0x3b   : > { %s370_s10 = sshll.u32 %s369_s29, 4  ;;  %s1864_s30 = sshll.u32 %s2319_s18, 7  ;;  %s371_s10 = int_to_ptr.hbm [resolvable:$true] %s370_s10 }
  0x3c   : > { %1947 = dma.hbm_to_vmem [thread:$0]  (!%p2490_p4), %s371_s10, 3072, %s373_s22, %s361_s12, %s2327_s25, %s2327_s25, %s2328_s2  }
  0x3d   : > { %s416_s8 = sshll.u32 %s408_s19, 4  ;;  %s413_s14 = scalar_lea.hbm %s2798_s5, %s1864_s30  ;;  %s417_s8 = int_to_ptr.vmem [resolvable:$true] %s416_s8 }
  0x3e   : > { %s414_s4 = sshll.u32 %s413_s14, 4  ;;  %s2329_s17 = smov 128   ;;  %s415_s4 = int_to_ptr.hbm [resolvable:$true] %s414_s4 }
  0x3f   : > { %s2330_s21 = smov 8   ;;  %s435_s2 = scalar_lea.hbm %s2799_s6, %s1864_s30 }
  0x40   : > { %1953 = dma.hbm_to_vmem [thread:$0]  (!%p2490_p4), %s415_s4, 2048, %s417_s8, %s2500_s11, %s2329_s17, %s2329_s17, %s2330_s21  }
  0x41   : > { %s430_s10 = scalar_lea.vmem [#allocation8], %s1585_s24  ;;  %s436_s12 = sshll.u32 %s435_s2, 4  ;;  %s437_s12 = int_to_ptr.hbm [resolvable:$true] %s436_s12 }
  0x42   : > { %s438_s22 = sshll.u32 %s430_s10, 4  ;;  %s427_s19 = scalar_lea.sflag [#allocation9], %s2486_s23  ;;  %s439_s22 = int_to_ptr.vmem [resolvable:$true] %s438_s22 }
  0x43   : > { %s2844_s1 = smov 4   ;;  %s2845_s25 = smov 64  }
  0x44   : > { %1956 = dma.hbm_to_vmem [thread:$0]  (!%p2490_p4), %s437_s12, 2048, %s439_s22, %s427_s19, %s2845_s25, %s2845_s25, %s2844_s1  }
  0x45   : > { %465 = sbr.rel (%p2510_p6) target bundleno = 1861 (0x745), region = 56  ;;  %s467_s8 = sand.u32 (!%p2510_p6), 1, %s2299_s13  }
  0x46   : > { %s1933_s11 = smul.u32 (!%p2510_p6), 192, %s467_s8  ;;  %s468_s3 = scalar_lea.sflag (!%p2510_p6), [#allocation3], %s467_s8 }
  0x48   : > { %s2542_s30 = scalar_lea.vmem (!%p2510_p6), [#allocation2], %s1933_s11 }
  0x4a   : > { %2266 = dma.done.wait (%p2459_p7), %s468_s3, 3072  }
  0x4b   : > { %2268 = vsyncadd (%p2459_p7), %s468_s3, 4294964224  ;;  %s477_s23 = sand.u32 1, %s2436_s20   ;;  %s1592_s26 = sshll.u32 %s467_s8, 6 }
  0x4c   : > { %s478_s24 = scalar_lea.sflag [#allocation6], %s477_s23  ;;  %s2549_s27 = scalar_lea.vmem [#allocation5], %s1592_s26 }
  0x4d   : > { %2270 = dma.done.wait (%p2459_p7), %s478_s24, 3072  }
  0x4e   : > { %2272 = vsyncadd (%p2459_p7), %s478_s24, 4294964224  ;;  %s1593_s9 = sshll.u32 %s467_s8, 7  ;;  %s498_s4 = scalar_lea.sflag [#allocation9], %s467_s8 }
  0x4f   : > { %s2555_s14 = scalar_lea.vmem [#allocation7], %s1593_s9  ;;  %s2557_s17 = scalar_lea.vmem [#allocation8], %s1593_s9 }
  0x50   : > { %2274 = dma.done.wait (%p2459_p7), %s498_s4, 2048  }
  0x51   : > { %2276 = vsyncadd (%p2459_p7), %s498_s4, 4294965248  ;;  %p582_p8 = scmp.lt.s32.totalorder %s2311_s16, 1  ;;  %v1688_v0 = vld [vmem:[%s2542_s30 + $0xa8] sm:$0xf]  ;;  %v1889_v1 = vld [vmem:[%s2542_s30 + $0xb0] sm:$0xf0] }
  0x52   : > { %v1888_v2 = vld [vmem:[%s2542_s30 + $0xac] sm:$0xf]  ;;  %v1689_v3 = vor.u32 %v1889_v1, %v1688_v0  ;;  %v1690_v4 = vld [vmem:[%s2542_s30 + $0xb4] sm:$0xf0]  ;;  %v1676_v5 = vld [vmem:[%s2542_s30 + $0x90] sm:$0xf] }
  0x53   : > { %v1886_v6 = vld [vmem:[%s2542_s30 + $0x98] sm:$0xf0]  ;;  %v1693_v7 = vor.u32 %v1888_v2, %v1690_v4  ;;  %v1885_v8 = vld [vmem:[%s2542_s30 + $0x94] sm:$0xf]  ;;  %v1678_v9 = vld [vmem:[%s2542_s30 + $0x9c] sm:$0xf0] }
  0x54   : > { %781 = vmatpush.bf16.msra.mxu0 %v1689_v3  ;;  %v1677_v10 = vor.u32 %v1886_v6, %v1676_v5  ;;  %v1681_v11 = vor.u32 %v1885_v8, %v1678_v9  ;;  %v1664_v12 = vld [vmem:[%s2542_s30 + $0x78] sm:$0xf]  ;;  %v1883_v13 = vld [vmem:[%s2542_s30 + $0x80] sm:$0xf0]  ;;  %v1882_v14 = vld [vmem:[%s2542_s30 + $0x7c] sm:$0xf] }
  0x55   : > { %794 = vmatpush.bf16.msra.mxu1 %v1693_v7  ;;  %v1666_v15 = vld [vmem:[%s2542_s30 + $0x84] sm:$0xf0]  ;;  %s2579_s20 = scalar_select %p582_p8, %s2311_s16, 1  ;;  %v1665_v16 = vor.u32 %v1883_v13, %v1664_v12  ;;  %v1652_v18 = vld [vmem:[%s2542_s30 + $0x60] sm:$0xf]  ;;  %vm847_vm0 = vcmask 64512  }
  0x56   : > { %v1669_v17 = vor.u32 %v1882_v14, %v1666_v15  ;;  %v1880_v19 = vld [vmem:[%s2542_s30 + $0x68] sm:$0xf0]  ;;  %v1879_v20 = vld [vmem:[%s2542_s30 + $0x64] sm:$0xf]  ;;  %v1654_v21 = vld [vmem:[%s2542_s30 + $0x6c] sm:$0xf0] }
  0x57   : > { %s1866_s28 = sshll.u32 %s2579_s20, 4  ;;  %p584_p7 = scmp.lt.s32.totalorder %s2307_s15, 1  ;;  %v1653_v22 = vor.u32 %v1880_v19, %v1652_v18  ;;  %v1657_v23 = vor.u32 %v1879_v20, %v1654_v21  ;;  %v1640_v24 = vld [vmem:[%s2542_s30 + $0x48] sm:$0xf]  ;;  %v1877_v25 = vld [vmem:[%s2542_s30 + $0x50] sm:$0xf0] }
  0x58   : > { %782 = vmatpush.bf16.msra.mxu0 %v1677_v10  ;;  %s2590_s2 = scalar_lea.vmem %s2800_s7, %s1866_s28  ;;  %v1876_v26 = vld [vmem:[%s2542_s30 + $0x4c] sm:$0xf]  ;;  %v1642_v27 = vld [vmem:[%s2542_s30 + $0x54] sm:$0xf0]  ;;  %v1641_v28 = vor.u32 %v1877_v25, %v1640_v24  ;;  %s1595_s22 = sshll.u32 %s2579_s20, 1  ;;  %vm864_vm1 = vcmask 1043456  }
  0x59   : > { %795 = vmatpush.bf16.msra.mxu1 %v1681_v11  ;;  %s585_s10 = scalar_select %p584_p7, %s2307_s15, 1  ;;  %v1645_v29 = vor.u32 %v1876_v26, %v1642_v27  ;;  %v1628_v30 = vld [vmem:[%s2542_s30 + $0x30] sm:$0xf]  ;;  %v1874_v31 = vld [vmem:[%s2542_s30 + $0x38] sm:$0xf0]  ;;  %v2623_v50 = vld [vmem:[%s2590_s2] sm:$0xff] }
  0x5a   : > { %v1873_v32 = vld [vmem:[%s2542_s30 + $0x34] sm:$0xf]  ;;  %v1630_v33 = vld [vmem:[%s2542_s30 + $0x3c] sm:$0xf0]  ;;  %v1629_v34 = vor.u32 %v1874_v31, %v1628_v30  ;;  %v1616_v36 = vld [vmem:[%s2542_s30 + $0x18] sm:$0xf] }
  0x5b   : > { %s2604_s12 = sadd.s32 %s1595_s22, %s585_s10  ;;  %v1633_v35 = vor.u32 %v1873_v32, %v1630_v33  ;;  %v1871_v37 = vld [vmem:[%s2542_s30 + $0x20] sm:$0xf0]  ;;  %v1870_v38 = vld [vmem:[%s2542_s30 + $0x1c] sm:$0xf]  ;;  %v1618_v39 = vld [vmem:[%s2542_s30 + $0x24] sm:$0xf0] }
  0x5c   : > { %783 = vmatpush.bf16.msra.mxu0 %v1665_v16  ;;  %s1596_s19 = sshll.u32 %s2604_s12, 3  ;;  %v1617_v40 = vor.u32 %v1871_v37, %v1616_v36  ;;  %v1621_v41 = vor.u32 %v1870_v38, %v1618_v39  ;;  %v1604_v42 = vld [vmem:[%s2542_s30] sm:$0xf]  ;;  %v1868_v43 = vld [vmem:[%s2542_s30 + $0x8] sm:$0xf0]  ;;  %v822_v51 = vperm.slane %v2623_v50, 1 }
  0x5d   : > { %796 = vmatpush.bf16.msra.mxu1 %v1669_v17  ;;  %s589_s8 = scalar_lea.vmem %s2793_s0, %s1596_s19  ;;  %v1867_v44 = vld [vmem:[%s2542_s30 + $0x4] sm:$0xf]  ;;  %v1606_v45 = vld [vmem:[%s2542_s30 + $0xc] sm:$0xf0]  ;;  %v1605_v46 = vor.u32 %v1868_v43, %v1604_v42  ;;  %v820_v53 = vperm.slane %v2623_v50, 0  ;;  %s2846_s23 = sld [smem:[#allocation27_spill]] }
  0x5e   : > { %v2618_v47 = vld [vmem:[%s589_s8] sm:$0xff]  ;;  %v1609_v48 = vor.u32 %v1867_v44, %v1606_v45  ;;  %v1696_v61 = vld [vmem:[%s2542_s30 + $0xb0] sm:$0xf]  ;;  %v1890_v62 = vld [vmem:[%s2542_s30 + $0xb8] sm:$0xf0]  ;;  %v824_v36 = vperm.slane %v2623_v50, 2 }
  0x5f   : > { %v620_v49 = vpack.c.bf16 %v2618_v47, %v2618_v47  ;;  %v1684_v63 = vld [vmem:[%s2542_s30 + $0x98] sm:$0xf]  ;;  %v1697_v0 = vor.u32 %v1890_v62, %v1696_v61  ;;  %v1887_v1 = vld [vmem:[%s2542_s30 + $0xa0] sm:$0xf0]  ;;  %v1672_v3 = vld [vmem:[%s2542_s30 + $0x80] sm:$0xf] }
  0x60   : > { %784 = vmatpush.bf16.msra.mxu0 %v1653_v22  ;;  %v1685_v2 = vor.u32 %v1887_v1, %v1684_v63  ;;  %v1884_v4 = vld [vmem:[%s2542_s30 + $0x88] sm:$0xf0]  ;;  %v1660_v6 = vld [vmem:[%s2542_s30 + $0x68] sm:$0xf]  ;;  %v1881_v7 = vld [vmem:[%s2542_s30 + $0x70] sm:$0xf0] }
  0x61   : > { %797 = vmatpush.bf16.msra.mxu1 %v1657_v23  ;;  %807 = vmatpush.bf16.msra.mxu2 %v1697_v0  ;;  %v1673_v5 = vor.u32 %v1884_v4, %v1672_v3  ;;  %v1661_v9 = vor.u32 %v1881_v7, %v1660_v6  ;;  %v1648_v10 = vld [vmem:[%s2542_s30 + $0x50] sm:$0xf]  ;;  %v1878_v11 = vld [vmem:[%s2542_s30 + $0x58] sm:$0xf0]  ;;  %v1636_v14 = vld [vmem:[%s2542_s30 + $0x38] sm:$0xf] }
  0x62   : > { %v1649_v13 = vor.u32 %v1878_v11, %v1648_v10  ;;  %v1875_v15 = vld [vmem:[%s2542_s30 + $0x40] sm:$0xf0]  ;;  %v1624_v18 = vld [vmem:[%s2542_s30 + $0x20] sm:$0xf]  ;;  %v1872_v19 = vld [vmem:[%s2542_s30 + $0x28] sm:$0xf0] }
  0x63   : > { %s596_s26 = scalar_lea.vmem %s2846_s23, %s2604_s12  ;;  %v1637_v17 = vor.u32 %v1875_v15, %v1636_v14  ;;  %v1625_v21 = vor.u32 %v1872_v19, %v1624_v18  ;;  %v1612_v23 = vld [vmem:[%s2542_s30 + $0x8] sm:$0xf]  ;;  %v1869_v24 = vld [vmem:[%s2542_s30 + $0x10] sm:$0xf0]  ;;  %v1895_v43 = vld [vmem:[%s2549_s27 + $0x20] sm:$0xff]  ;;  %v2331_v62 = vmov 128.0  }
  0x64   : > { %785 = vmatpush.bf16.msra.mxu0 %v1641_v28  ;;  %v615_v8 = vld [vmem:[%s596_s26] sm:$0x1]  ;;  %v1613_v27 = vor.u32 %v1869_v24, %v1612_v23  ;;  %v1896_v42 = vld [vmem:[%s2549_s27 + $0x28] sm:$0xff]  ;;  %v1894_v44 = vld [vmem:[%s2549_s27 + $0x18] sm:$0xff]  ;;  %s2849_s20 = sld [smem:[#allocation28_spill]]  ;;  %s1860_s21 = sshll.u32 %s2311_s16, 1 }
  0x65   : > { %798 = vmatpush.bf16.msra.mxu1 %v1645_v29  ;;  %808 = vmatpush.bf16.msra.mxu2 %v1685_v2  ;;  %v841_v12 = vsub.f32 1.0, %v615_v8  ;;  %v1893_v45 = vld [vmem:[%s2549_s27 + $0x10] sm:$0xff]  ;;  %v1914_v0 = vld [vmem:[%s2555_s14 + $0x74] sm:$0xf0]  ;;  %v1791_v3 = vld [vmem:[%s2555_s14 + $0x78] sm:$0xf0] }
  0x66   : > { %v1789_v63 = vld [vmem:[%s2555_s14 + $0x70] sm:$0xf]  ;;  %v1913_v1 = vld [vmem:[%s2555_s14 + $0x74] sm:$0xf]  ;;  %v1781_v14 = vld [vmem:[%s2555_s14 + $0x60] sm:$0xf] }
  0x67   : > { %v842_v16 = vmul.f32 1e+09, %v841_v12  ;;  %v1790_v2 = vor.u32 %v1914_v0, %v1789_v63  ;;  %v1794_v4 = vor.u32 %v1913_v1, %v1791_v3  ;;  %v1912_v15 = vld [vmem:[%s2555_s14 + $0x64] sm:$0xf0]  ;;  %v1783_v18 = vld [vmem:[%s2555_s14 + $0x68] sm:$0xf0] }
  0x68   : > { %786 = vmatpush.bf16.msra.mxu0 %v1629_v34  ;;  %v1775_v24 = vld [vmem:[%s2555_s14 + $0x58] sm:$0xf0]  ;;  %v1929_v63 = vld [vmem:[%s2557_s17 + $0x70] sm:$0xff]  ;;  %s2851_s25 = sld [smem:[#allocation32_spill]] }
  0x69   : > { %799 = vmatpush.bf16.msra.mxu1 %v1633_v35  ;;  %809 = vmatpush.bf16.msra.mxu2 %v1673_v5  ;;  %v844_v20 = vperm.slane %v842_v16, 0  ;;  %v1911_v16 = vld [vmem:[%s2555_s14 + $0x64] sm:$0xf] }
  0x6a   : > { %v1786_v19 = vor.u32 %v1911_v16, %v1783_v18  ;;  %v1928_v16 = vld [vmem:[%s2557_s17 + $0x68] sm:$0xff]  ;;  %v1918_v18 = vld [vmem:[%s2557_s17 + $0x18] sm:$0xff]  ;;  %s603_s28 = scalar_lea.vmem %s2849_s20, %s2604_s12 }
  0x6c   : > { %787 = vmatpush.bf16.msra.mxu0 %v1617_v40  ;;  %v1898_v40 = vld [vmem:[%s2549_s27 + $0x38] sm:$0xff] }
  0x6d   : > { %800 = vmatpush.bf16.msra.mxu1 %v1621_v41  ;;  %810 = vmatpush.bf16.msra.mxu2 %v1661_v9  ;;  %v1897_v41 = vld [vmem:[%s2549_s27 + $0x30] sm:$0xff] }
  0x6e   : > { %s2213_s30 = scalar_lea.hbm %s2851_s25, 4 }
  0x70   : > { %788 = vmatpush.bf16.msra.mxu0 %v1605_v46 }
  0x71   : > { %801 = vmatpush.bf16.msra.mxu1 %v1609_v48  ;;  %811 = vmatpush.bf16.msra.mxu2 %v1649_v13  ;;  %v1892_v48 = vld [vmem:[%s2549_s27 + $0x8] sm:$0xff] }
  0x73   : > { %789 = vmatmul.bf16.vlgmr.msra.gmra.mxu0 %v620_v49 }
  0x74   : > { %802 = vmatmul.bf16.vlgmr.msra.gmra.mxu1 %v620_v49  ;;  %1126 = vmatpush.bf16.msrb.mxu0 %v1790_v2 }
  0x75   : > { %812 = vmatpush.bf16.msra.mxu2 %v1637_v17  ;;  %v1782_v17 = vor.u32 %v1912_v15, %v1781_v14  ;;  %v1920_v15 = vld [vmem:[%s2557_s17 + $0x28] sm:$0xff] }
  0x78   : > { %1127 = vmatpush.bf16.msrb.mxu0 %v1782_v17  ;;  %v1927_v17 = vld [vmem:[%s2557_s17 + $0x60] sm:$0xff] }
  0x79   : > { %813 = vmatpush.bf16.msra.mxu2 %v1625_v21  ;;  %v1910_v21 = vld [vmem:[%s2555_s14 + $0x54] sm:$0xf0] }
  0x7d   : > { %814 = vmatpush.bf16.msra.mxu2 %v1613_v27  ;;  %v1908_v27 = vld [vmem:[%s2555_s14 + $0x44] sm:$0xf0] }
  0x80   : > { %815 = vmatmul.bf16.vlgmr.msra.gmra.mxu2 %v620_v49 }
  0xf0   : > { %v790_v52 = vpop.f32.mrf.mxu0 }
  0xf1   : > { %v803_v54 = vpop.f32.mrf.mxu1  ;;  %v821_v57 = vadd.f32 %v820_v53, %v790_v52  ;;  %v1891_v53 = vld [vmem:[%s2549_s27] sm:$0xff]  ;;  %s2847_s27 = sld [smem:[#allocation31_spill]] }
  0xf2   : > { %v823_v55 = vadd.f32 %v822_v51, %v803_v54 }
  0xf3   : > { %v826_v59 = vpack.c.bf16 %v821_v57, %v821_v57  ;;  %v898_v57 = vperm.slane %v2623_v50, 3 }
  0xf4   : > { %v827_v56 = vpack.c.bf16 %v823_v55, %v823_v55 }
  0xf6   : > { %835 = vmatpush.bf16.xpose.msrb.mxu1 %v827_v56 }
  0xf7   : > { %s612_s9 = scalar_lea.vmem %s2847_s27, %s1595_s22  ;;  %s1355_s22 = sadd.s32 %s2307_s15, %s1860_s21 }
  0xf8   : > { %v792_v58 = vpop.f32.mrf.mxu0  ;;  %s1356_s8 = scalar_lea.hbm %s2851_s25, %s1355_s22 }
  0xf9   : > { %v805_v60 = vpop.f32.mrf.mxu1  ;;  %s1360_s3 = sshll.u32 %s1356_s8, 4  ;;  %s1361_s3 = int_to_ptr.hbm [resolvable:$true] %s1360_s3 }
  0xfa   : > { %s2207_s23 = sshra.s32 %s1361_s3, 4  ;;  %s2208_s23 = int_to_ptr.hbm [resolvable:$true] %s2207_s23 }
  0xfb   : > { %s2209_s26 = scalar_lea.hbm %s2208_s23, 1  ;;  %p2214_p13 = scmp.lt.s32.totalorder %s2208_s23, %s2851_s25 }
  0xfc   : > { %p2210_p9 = scmp.ne.s32.totalorder %s2208_s23, %s2209_s26  ;;  %p2215_p0 = scmp.lt.s32.totalorder %s2213_s30, %s2209_s26 }
  0xfd   : > { %836 = vmatmul.bf16.vlgmr.msrb.gmra.mxu1 %v826_v59 }
  0xfe   : > { %1139 = vmatpush.bf16.msra.mxu1 %v1794_v4  ;;  %p2211_p10 = pnand %p2210_p9, %p2468_p12  ;;  %p2216_p1 = por %p2215_p0, %p2214_p13 }
 0x100   : > { %p2212_p11 = pneg %p2211_p10 }
 0x102   : > { %1140 = vmatpush.bf16.msra.mxu1 %v1786_v19  ;;  %v1926_v19 = vld [vmem:[%s2557_s17 + $0x58] sm:$0xff]  ;;  %p2217_p4 = pnand %p2216_p1, %p2212_p11 }
 0x103   : > { %v816_v34 = vpop.f32.mrf.mxu2 }
 0x104   : > { %v825_v37 = vadd.f32 %v824_v36, %v816_v34  ;;  %v1905_v34 = vld [vmem:[%s2555_s14 + $0x34] sm:$0xf]  ;;  %v1759_v36 = vld [vmem:[%s2555_s14 + $0x38] sm:$0xf0] }
 0x106   : > { %v860_v38 = vpack.c.bf16 %v825_v37, %v825_v37  ;;  %v1762_v37 = vor.u32 %v1905_v34, %v1759_v36 }
 0x108   : > { %v866_v39 = vsel %vm864_vm1, %v860_v38, 0  ;;  %v1749_v38 = vld [vmem:[%s2555_s14 + $0x20] sm:$0xf] }
 0x109   : > { %875 = vmatpush.bf16.msra.mxu3 %v866_v39  ;;  %v1904_v39 = vld [vmem:[%s2555_s14 + $0x24] sm:$0xf0] }
 0x10b   : > { %v818_v35 = vpop.f32.mrf.mxu2 }
 0x10d   : > { %947 = vmatpush.bf16.msrb.mxu3 %v1898_v40  ;;  %v1903_v40 = vld [vmem:[%s2555_s14 + $0x24] sm:$0xf] }
 0x111   : > { %948 = vmatpush.bf16.msrb.mxu3 %v1897_v41  ;;  %v1750_v41 = vor.u32 %v1904_v39, %v1749_v38 }
 0x115   : > { %949 = vmatpush.bf16.msrb.mxu3 %v1896_v42  ;;  %v1751_v42 = vld [vmem:[%s2555_s14 + $0x28] sm:$0xf0] }
 0x119   : > { %950 = vmatpush.bf16.msrb.mxu3 %v1895_v43  ;;  %v1754_v43 = vor.u32 %v1903_v40, %v1751_v42 }
 0x11d   : > { %951 = vmatpush.bf16.msrb.mxu3 %v1894_v44  ;;  %v1741_v44 = vld [vmem:[%s2555_s14 + $0x10] sm:$0xf] }
 0x121   : > { %952 = vmatpush.bf16.msrb.mxu3 %v1893_v45  ;;  %v1902_v45 = vld [vmem:[%s2555_s14 + $0x14] sm:$0xf0] }
 0x125   : > { %953 = vmatpush.bf16.msrb.mxu3 %v1892_v48  ;;  %v1742_v48 = vor.u32 %v1902_v45, %v1741_v44 }
 0x129   : > { %954 = vmatpush.bf16.msrb.mxu3 %v1891_v53  ;;  %v1900_v53 = vld [vmem:[%s2555_s14 + $0x4] sm:$0xf0] }
 0x17a   : > { %v837_v22 = vpop.f32.mrf.mxu1 }
 0x17b   : > { %v846_v25 = vsub.f32 %v837_v22, %v844_v20  ;;  %v1773_v20 = vld [vmem:[%s2555_s14 + $0x50] sm:$0xf]  ;;  %v1909_v22 = vld [vmem:[%s2555_s14 + $0x54] sm:$0xf] }
 0x17c   : > { %v1774_v23 = vor.u32 %v1910_v21, %v1773_v20  ;;  %v1917_v20 = vld [vmem:[%s2557_s17 + $0x10] sm:$0xff] }
 0x17d   : > { %v848_v26 = vsel %vm847_vm0, %v846_v25, -inf  ;;  %v1925_v21 = vld [vmem:[%s2557_s17 + $0x50] sm:$0xff] }
 0x17e   : > { %849 = vmax.xlane.f32.xlu0 %v848_v26  ;;  %1128 = vmatpush.bf16.msrb.mxu0 %v1774_v23  ;;  %v1765_v26 = vld [vmem:[%s2555_s14 + $0x40] sm:$0xf]  ;;  %v1924_v23 = vld [vmem:[%s2557_s17 + $0x48] sm:$0xff] }
 0x182   : > { %v839_v28 = vpop.f32.mrf.mxu1 }
 0x183   : > { %v1907_v28 = vld [vmem:[%s2555_s14 + $0x44] sm:$0xf] }
 0x1f1   : > { %v850_v29 = vpop.xlane.xlu0 %849 }
 0x1f2   : > { %v851_v30 = vsub.f32 %v846_v25, %v850_v29  ;;  %v1778_v25 = vor.u32 %v1909_v22, %v1775_v24  ;;  %v1766_v29 = vor.u32 %v1908_v27, %v1765_v26  ;;  %v1916_v22 = vld [vmem:[%s2557_s17 + $0x8] sm:$0xff]  ;;  %v1915_v24 = vld [vmem:[%s2557_s17] sm:$0xff] }
 0x1f3   : > { %v619_v26 = vld [vmem:[%s612_s9] sm:$0x3] }
 0x1f4   : > { %v852_v31 = vmul.f32 1.442695, %v851_v30  ;;  %1141 = vmatpush.bf16.msra.mxu1 %v1778_v25  ;;  %v1767_v30 = vld [vmem:[%s2555_s14 + $0x48] sm:$0xf0]  ;;  %1129 = vmatpush.bf16.msrb.mxu0 %v1766_v29  ;;  %v1923_v25 = vld [vmem:[%s2557_s17 + $0x40] sm:$0xff]  ;;  %v1042_v27 = vperm.slane %v619_v26, 0 }
 0x1f6   : > { %2059 = vpow2.f32 %v852_v31  ;;  %v1770_v31 = vor.u32 %v1907_v28, %v1767_v30  ;;  %v1043_v28 = vperm.slane %v619_v26, 1 }
 0x1f8   : > { %1142 = vmatpush.bf16.msra.mxu1 %v1770_v31 }
 0x1fc   : > { %v2060_v32 = vpop.eup %2059  ;;  %1143 = vmatpush.bf16.msra.mxu1 %v1762_v37 }
 0x1fd   : > { %v854_v33 = vsel %vm847_vm0, %v2060_v32, 0.0 }
 0x1fe   : > { %855 = vadd.xlane.f32.xlu0 %v854_v33  ;;  %v1906_v33 = vld [vmem:[%s2555_s14 + $0x34] sm:$0xf0] }
 0x200   : > { %1144 = vmatpush.bf16.msra.mxu1 %v1754_v43 }
 0x271   : > { %v856_v46 = vpop.xlane.xlu0 %855 }
 0x272   : > { %2061 = vrcp.f32 %v856_v46  ;;  %v1901_v46 = vld [vmem:[%s2555_s14 + $0x14] sm:$0xf] }
 0x273   : > { %2063 = vrcp.f32 %v2331_v62  ;;  %v1921_v62 = vld [vmem:[%s2557_s17 + $0x30] sm:$0xff] }
 0x278   : > { %v2062_v49 = vpop.eup %2061 }
 0x279   : > { %v858_v51 = vmul.f32 %v2062_v49, %v2060_v32  ;;  %v2064_v5 = vpop.eup %2063  ;;  %v1757_v32 = vld [vmem:[%s2555_s14 + $0x30] sm:$0xf]  ;;  %v1743_v49 = vld [vmem:[%s2555_s14 + $0x18] sm:$0xf0] }
 0x27a   : > { %v964_v6 = vmul.f32 128.0, %v2064_v5  ;;  %vm968_vm2 = vweird.f32 %v2064_v5  ;;  %v1758_v35 = vor.u32 %v1906_v33, %v1757_v32 }
 0x27b   : > { %v859_v52 = vpack.c.bf16 %v858_v51, %v858_v51  ;;  %v1746_v51 = vor.u32 %v1901_v46, %v1743_v49 }
 0x27c   : > { %v965_v7 = vsub.f32 1.0, %v964_v6  ;;  %1130 = vmatpush.bf16.msrb.mxu0 %v1758_v35 }
 0x27d   : > { %1698 = vmatmul.msk.bf16.vlgmr.msra.gmra.mxu3 %vm847_vm0, %v859_v52  ;;  %v1733_v52 = vld [vmem:[%s2555_s14] sm:$0xf]  ;;  %1145 = vmatpush.bf16.msra.mxu1 %v1746_v51 }
 0x280   : > { %1131 = vmatpush.bf16.msrb.mxu0 %v1750_v41 }
 0x284   : > { %1132 = vmatpush.bf16.msrb.mxu0 %v1742_v48 }
 0x300   : > { %v877_v54 = vpop.f32.mrf.mxu3 }
 0x301   : > { %v881_v55 = vpack.c.bf16 %v877_v54, %v877_v54  ;;  %v1899_v54 = vld [vmem:[%s2555_s14 + $0x4] sm:$0xf] }
 0x303   : > { %955 = vmatmul.bf16.vlgmr.msrb.gmra.mxu3 %v881_v55  ;;  %v1734_v55 = vor.u32 %v1900_v53, %v1733_v52 }
 0x305   : > { %1133 = vmatpush.bf16.msrb.mxu0 %v1734_v55 }
 0x308   : > { %v879_v56 = vpop.f32.mrf.mxu3 }
 0x309   : > { %v1735_v56 = vld [vmem:[%s2555_s14 + $0x8] sm:$0xf0]  ;;  %s2848_s14 = sld [smem:[#allocation16_spill]] }
 0x30f   : > { %s580_s10 = sand.u32 1, %s2848_s14  }
 0x310   : > { %s581_s11 = scalar_lea.vmem [#allocation10], %s580_s10  ;;  %s1346_s12 = scalar_lea.sflag [#allocation4], %s580_s10 }
 0x386   : > { %v956_v58 = vpop.f32.mrf.mxu3 }
 0x387   : > { %v957_v59 = vadd.f32 %v956_v58, %v898_v57  ;;  %v1738_v57 = vor.u32 %v1899_v54, %v1735_v56  ;;  %v1922_v58 = vld [vmem:[%s2557_s17 + $0x38] sm:$0xff] }
 0x388   : > { %1268 = vmatpush.bf16.msrb.mxu2 %v1922_v58 }
 0x389   : > { %v960_v60 = vadd.f32 %v957_v59, %v2618_v47  ;;  %v966_v47 = vmul.f32 %v2064_v5, %v965_v7  ;;  %1146 = vmatpush.bf16.msra.mxu1 %v1738_v57  ;;  %v1930_v59 = vld [vmem:[%s2557_s17 + $0x78] sm:$0xff]  ;;  %v988_v7 = vperm.slane %v2623_v50, 4 }
 0x38a   : > { %1281 = vmatpush.bf16.msra.mxu3 %v1930_v59 }
 0x38b   : > { %961 = vadd.xlane.f32.xlu1 %v960_v60  ;;  %v967_v8 = vadd.f32 %v2064_v5, %v966_v47 }
 0x38c   : > { %1269 = vmatpush.bf16.msrb.mxu2 %v1921_v62 }
 0x38d   : > { %v2665_v9 = vsel %vm968_vm2, %v2064_v5, %v967_v8 }
 0x38e   : > { %v958_v61 = vpop.f32.mrf.mxu3  ;;  %1282 = vmatpush.bf16.msra.mxu3 %v1929_v63 }
 0x390   : > { %1270 = vmatpush.bf16.msrb.mxu2 %v1920_v15  ;;  %v1317_v15 = vperm.slane %v2623_v50, 7 }
 0x392   : > { %1283 = vmatpush.bf16.msra.mxu3 %v1928_v16 }
 0x396   : > { %1284 = vmatpush.bf16.msra.mxu3 %v1927_v17 }
 0x39a   : > { %1285 = vmatpush.bf16.msra.mxu3 %v1926_v19  ;;  %v616_v19 = vld [vmem:[%s603_s28] sm:$0x1] }
 0x39e   : > { %1286 = vmatpush.bf16.msra.mxu3 %v1925_v21 }
 0x3a2   : > { %1287 = vmatpush.bf16.msra.mxu3 %v1924_v23 }
 0x3a6   : > { %1288 = vmatpush.bf16.msra.mxu3 %v1923_v25 }
 0x3fe   : > { %v962_v10 = vpop.xlane.xlu1 %961 }
 0x3ff   : > { %v970_v11 = vmul.f32 %v2665_v9, %v962_v10  ;;  %v990_v10 = vperm.slane %v2623_v50, 5 }
 0x401   : > { %v2668_v12 = vsub.f32 %v960_v60, %v970_v11 }
 0x403   : > { %v972_v13 = vmul.f32 %v2668_v12, %v2668_v12 }
 0x405   : > { %973 = vadd.xlane.f32.xlu1 %v972_v13 }
 0x478   : > { %v974_v60 = vpop.xlane.xlu1 %973 }
 0x479   : > { %v975_v61 = vmul.f32 %v974_v60, %v2665_v9  ;;  %v1295_v60 = vperm.slane %v2623_v50, 6 }
 0x47b   : > { %v976_v0 = vadd.f32 1e-05, %v975_v61 }
 0x47d   : > { %2065 = vrsqrt.f32 %v976_v0  ;;  %vm983_vm4 = vweird.f32 %v976_v0 }
 0x483   : > { %v2066_v1 = vpop.eup %2065 }
 0x484   : > { %v978_v2 = vmul.f32 %v2066_v1, %v976_v0  ;;  %vm984_vm3 = vweird.f32 %v2066_v1 }
 0x485   : > { %vm985_vm5 = vmor %vm983_vm4, %vm984_vm3 }
 0x486   : > { %v979_v3 = vmul.f32 %v2066_v1, %v978_v2 }
 0x488   : > { %v980_v4 = vmul.f32 0.5, %v979_v3 }
 0x48a   : > { %v981_v5 = vsub.f32 1.5, %v980_v4 }
 0x48c   : > { %v982_v6 = vmul.f32 %v2066_v1, %v981_v5 }
 0x48e   : > { %v986_v47 = vsel %vm985_vm5, %v2066_v1, %v982_v6 }
 0x48f   : > { %v987_v8 = vmul.f32 %v986_v47, %v2668_v12  ;;  %v1919_v12 = vld [vmem:[%s2557_s17 + $0x20] sm:$0xff] }
 0x490   : > { %1271 = vmatpush.bf16.msrb.mxu2 %v1919_v12 }
 0x491   : > { %v989_v11 = vmul.f32 %v988_v7, %v987_v8 }
 0x493   : > { %v2708_v13 = vadd.f32 %v990_v10, %v989_v11 }
 0x494   : > { %1272 = vmatpush.bf16.msrb.mxu2 %v1918_v18 }
 0x495   : > { %v992_v14 = vpack.c.bf16 %v2708_v13, %v2708_v13 }
 0x497   : > { %1134 = vmatmul.bf16.vlgmr.msrb.gmra.mxu0 %v992_v14  ;;  %1147 = vmatmul.bf16.vlgmr.msra.gmra.mxu1 %v992_v14 }
 0x498   : > { %1273 = vmatpush.bf16.msrb.mxu2 %v1917_v20 }
 0x49c   : > { %1274 = vmatpush.bf16.msrb.mxu2 %v1916_v22 }
 0x4a0   : > { %1275 = vmatpush.bf16.msrb.mxu2 %v1915_v24 }
 0x514   : > { %v1135_v29 = vpop.f32.mrf.mxu0  ;;  %v1148_v30 = vpop.f32.mrf.mxu1 }
 0x515   : > { %v1136_v31 = vadd.f32 %v1135_v29, %v1042_v27  ;;  %v1149_v32 = vadd.f32 %v1148_v30, %v1043_v28 }
 0x517   : > { %v1154_v33 = vmul.f32 0.044715, %v1136_v31  ;;  %v1155_v34 = vmul.f32 0.044715, %v1149_v32  ;;  %v1152_v48 = vmul.f32 0.5, %v1136_v31  ;;  %v1153_v51 = vmul.f32 0.5, %v1149_v32 }
 0x519   : > { %v1156_v35 = vmul.f32 %v1154_v33, %v1136_v31  ;;  %v1157_v36 = vmul.f32 %v1155_v34, %v1149_v32 }
 0x51b   : > { %v1159_v37 = vmul.f32 %v1157_v36, %v1149_v32  ;;  %v1158_v38 = vmul.f32 %v1156_v35, %v1136_v31 }
 0x51c   : > { %v1137_v39 = vpop.f32.mrf.mxu0  ;;  %v1150_v40 = vpop.f32.mrf.mxu1 }
 0x51d   : > { %v1160_v41 = vadd.f32 %v1158_v38, %v1136_v31  ;;  %v1161_v42 = vadd.f32 %v1159_v37, %v1149_v32 }
 0x51f   : > { %v1162_v43 = vmul.f32 0.7978846, %v1160_v41  ;;  %v1163_v44 = vmul.f32 0.7978846, %v1161_v42 }
 0x521   : > { %2067 = vtanh.f32 %v1162_v43 }
 0x522   : > { %2069 = vtanh.f32 %v1163_v44 }
 0x527   : > { %v2068_v45 = vpop.eup %2067 }
 0x528   : > { %v2070_v46 = vpop.eup %2069  ;;  %v1166_v49 = vadd.f32 1.0, %v2068_v45 }
 0x529   : > { %v1167_v52 = vadd.f32 1.0, %v2070_v46 }
 0x52a   : > { %v1168_v53 = vmul.f32 %v1166_v49, %v1152_v48 }
 0x52b   : > { %v1169_v54 = vmul.f32 %v1167_v52, %v1153_v51 }
 0x52c   : > { %v1170_v55 = vpack.c.bf16 %v1168_v53, %v1168_v53 }
 0x52d   : > { %v1171_v56 = vpack.c.bf16 %v1169_v54, %v1169_v54 }
 0x52e   : > { %1276 = vmatmul.bf16.vlgmr.msrb.gmra.mxu2 %v1170_v55 }
 0x52f   : > { %1289 = vmatmul.bf16.vlgmr.msra.gmra.mxu3 %v1171_v56 }
 0x5b1   : > { %v1277_v57 = vpop.f32.mrf.mxu2 }
 0x5b2   : > { %v1290_v58 = vpop.f32.mrf.mxu3 }
 0x5b3   : > { %v1291_v59 = vadd.f32 %v1290_v58, %v1277_v57 }
 0x5b5   : > { %v1294_v61 = vadd.f32 %v1291_v59, %v2708_v13 }
 0x5b7   : > { %v1296_v62 = vadd.f32 %v1295_v60, %v1294_v61 }
 0x5b9   : > { %1297 = vadd.xlane.f32.xlu2 %v1296_v62  ;;  %v1279_v63 = vpop.f32.mrf.mxu2 }
 0x5ba   : > { %v1292_v0 = vpop.f32.mrf.mxu3 }
 0x62c   : > { %v1298_v1 = vpop.xlane.xlu2 %1297 }
 0x62d   : > { %v1299_v2 = vmul.f32 %v1298_v1, %v2665_v9 }
 0x62f   : > { %v1300_v3 = vsub.f32 %v1296_v62, %v1299_v2 }
 0x631   : > { %v1301_v4 = vmul.f32 %v1300_v3, %v1300_v3 }
 0x633   : > { %1302 = vadd.xlane.f32.xlu2 %v1301_v4 }
 0x6a6   : > { %v1303_v5 = vpop.xlane.xlu2 %1302 }
 0x6a7   : > { %v1304_v6 = vmul.f32 %v1303_v5, %v2665_v9  ;;  %v2058_v9 = vld [vmem:[%s2590_s2 + $0x8] ss:$0 sm:$0xff]  ;;  %s1358_s2 = sshll.u32 %s581_s11, 4  ;;  %s1359_s2 = int_to_ptr.vmem [resolvable:$true] %s1358_s2 }
 0x6a9   : > { %v1305_v7 = vadd.f32 1e-05, %v1304_v6 }
 0x6ab   : > { %2071 = vrsqrt.f32 %v1305_v7  ;;  %vm1312_vm7 = vweird.f32 %v1305_v7 }
 0x6b1   : > { %v2072_v47 = vpop.eup %2071 }
 0x6b2   : > { %v1307_v8 = vmul.f32 %v2072_v47, %v1305_v7  ;;  %vm1313_vm6 = vweird.f32 %v2072_v47 }
 0x6b3   : > { %vm1314_vm8 = vmor %vm1312_vm7, %vm1313_vm6 }
 0x6b4   : > { %v1308_v10 = vmul.f32 %v2072_v47, %v1307_v8 }
 0x6b6   : > { %v1309_v11 = vmul.f32 0.5, %v1308_v10 }
 0x6b8   : > { %v1310_v13 = vsub.f32 1.5, %v1309_v11 }
 0x6ba   : > { %v1311_v14 = vmul.f32 %v2072_v47, %v1310_v13 }
 0x6bc   : > { %v1315_v16 = vsel %vm1314_vm8, %v2072_v47, %v1311_v14 }
 0x6bd   : > { %v1316_v12 = vmul.f32 %v1315_v16, %v1300_v3 }
 0x6bf   : > { %v1318_v17 = vmul.f32 %v1317_v15, %v1316_v12 }
 0x6c1   : > { %v1320_v18 = vadd.f32 %v2058_v9, %v1318_v17 }
 0x6c3   : > { %1339 = vmatpush.msra.mxu0 %v1320_v18 }
 0x6c4   : > { %1859 = vmatmul.msk.f32.vlgmr.msra.gmra.mxu0 %vm847_vm0, %v616_v19 }
 0x741   : > { %v1341_v50 = vpop.f32.mrf.mxu0 }
 0x742   : > { %1344 = vst [vmem:[%s581_s11] sm:$0x1] %v1341_v50 }
 0x743   : > { %2220 = shalt.err (!%p2217_p4)
}
 0x744   : > { %1942 = dma.vmem_to_hbm [thread:$0]  (%p2468_p12), %s1359_s2, 16, %s1361_s3, %s1346_s12  }
 0x745 PF: > { %s2852_s9 = sld [smem:[#allocation20_spill]] }
 0x746   : > { %s2853_s14 = sld [smem:[#allocation15_spill]] }
 0x74b   : > { %p1962_p3 = scmp.ge.s32.totalorder %s2852_s9, 2 }
 0x74c   : > { %s1372_s17 = sand.u32 1, %s2853_s14  }
 0x74d   : > { %p1958_p5 = pnand %p1962_p3, %p2481_p2  ;;  %s1373_s20 = scalar_lea.sflag [#allocation4], %s1372_s17 }
 0x74f   : > { %p1959_p6 = pneg %p1958_p5 }
 0x751   : > { %2278 = dma.done.wait (%p1959_p6), %s1373_s20, 16  }
 0x752   : > { %2280 = vsyncadd (%p1959_p6), %s1373_s20, 4294967280  ;;  %s31_s19 = sadd.s32 1, %s2852_s9   ;;  %s2855_s30 = sld [smem:[#allocation16_spill]] }
 0x753   : > { %p28_p8 = scmp.ge.s32.totalorder %s31_s19, 6   ;;  %s2856_s10 = sld [smem:[#allocation17_spill]] }
 0x754   : > { %s2857_s11 = sld [smem:[#allocation25_spill]]  ;;  %s2863_s12 = smov %s2299_s13 }
 0x755   : > { %s2858_s28 = sld [smem:[#allocation18_spill]]  ;;  %s2865_s16 = smov %s2319_s18 }
 0x756   : > { %s2859_s14 = sld [smem:[#allocation24_spill]] }
 0x757   : > { %s2860_s15 = sld [smem:[#allocation19_spill]] }
 0x758   : > { %s2861_s17 = sld [smem:[#allocation21_spill]] }
 0x759   : > { %s2862_s21 = sld [smem:[#allocation22_spill]] }
 0x75b   : > { %s2864_s13 = smov %s2858_s28  ;;  %30 = sbr.rel (!%p28_p8) target bundleno = 20 (0x14), region = 153 }
 0x75f   : > { %s2866_s18 = smov %s2862_s21 }
 0x760   :  { %1378 = vsyncpa [#allocation3], 1 }
 0x761   :  { %1380 = vsyncpa [#allocation3 + $0x1], 1 }
 0x762   :  { %1381 = vsyncpa [#allocation6], 1 }
 0x763   :  { %1383 = vsyncpa [#allocation6 + $0x1], 1 }
 0x764   :  { %1384 = vsyncpa [#allocation9], 1 }
 0x765   :  { %1386 = vsyncpa [#allocation9 + $0x1], 1 }
 0x766   :  { %1387 = vsyncpa [#allocation4], 1 }
 0x767   :  { %1389 = vsyncpa [#allocation4 + $0x1], 1 }

</bundles_post_ra>
